<compile_context>
chip_gen: v7x
topology: tpu7x:2x2x1
jax: 0.10.0
libtpu: 0.0.40
codegen_flags: <defaults>
</compile_context>

<pallas_src>
import math

import numpy as np
import jax
import jax.numpy as jnp
from jax import lax
from jax.experimental import pallas as pl
from jax.experimental.pallas import tpu as pltpu


def _vmem_spec():
    # Whole array resident in VMEM (all shapes here are tiny).
    return pl.BlockSpec(memory_space=pltpu.MemorySpace.VMEM)


def _fast_recip(x):
    # EUP-seeded reciprocal (approx) + one Newton step: the seed runs in the
    # EUP slot (effectively free in the bundle); the refinement is 2 VPU ops.
    r = pl.reciprocal(x, approx=True)
    return r * (2.0 - x * r)


def _gmm_fused_kernel(z_ref, wlin_ref, b_ref, expand_ref, seg_ref,
                      diagf_ref, blkf_ref, energy_ref, m_ref):
    """Fused GMM energy.

    z_ref: (N, D)   wlin_ref: (K, D)   b_ref: (1, K)
    expand_ref: (K, KD)  seg_ref: (KD, K)  diagf_ref: (KD, D)  blkf_ref: (KD, KD)
    energy_ref: (1, 1)   m_ref: VMEM scratch (KD, 2D) for the Gauss-Jordan slab.
    """
    N, D = z_ref.shape
    K = wlin_ref.shape[0]
    KD = K * D
    eps = jnp.float32(1e-5)
    two_pi = jnp.float32(2.0 * math.pi)
    f32 = jnp.float32

    z = z_ref[...]                                           # (N, D)
    diagf = diagf_ref[...]                                   # (KD, D) stacked I
    seg = seg_ref[...]                                       # (KD, K) block membership

    # ---- component responsibilities: softmax(z @ W^T + b) ----------------
    logits = jnp.einsum('nd,kd->nk', z, wlin_ref[...],
                        preferred_element_type=f32) + b_ref[...]
    logits = logits - jnp.max(logits, axis=-1, keepdims=True)
    e = jnp.exp(logits)
    resp = e * _fast_recip(jnp.sum(e, axis=-1, keepdims=True))   # (N, K)

    # ---- center the data (robust one-pass covariance; shift-invariant) ---
    zbar = jnp.sum(z, axis=0, keepdims=True) * f32(1.0 / N)
    zc = z - zbar                                            # (N, D)

    # ---- weighted moments in the lane-dense stacked layout ---------------
    resp_rep = jnp.dot(resp, expand_ref[...],
                       preferred_element_type=f32)           # (N, KD)
    zc_rep = jnp.tile(zc, (1, K))                            # (N, KD)
    sum_w_rep = jnp.sum(resp_rep, axis=0, keepdims=True)     # (1, KD)
    inv_sum_w = _fast_recip(sum_w_rep)                       # (1, KD)
    mu_flat = jnp.sum(resp_rep * zc_rep, axis=0, keepdims=True) * inv_sum_w
    zm = zc_rep - mu_flat                                    # (N, KD)

    # One augmented matmul yields the stacked covariance AND the per-k
    # responsibility sums as a (K, 1) column (no ones-matmul, no transpose).
    lhs_aug = jnp.concatenate([(resp_rep * inv_sum_w) * zm, resp], axis=1)
    rhs_aug = jnp.concatenate([zc, jnp.ones((N, 1), f32)], axis=1)
    moments = jnp.einsum('nc,nd->cd', lhs_aug, rhs_aug,
                         preferred_element_type=f32)         # (KD+K, D+1)
    cov = moments[:KD, :D] + eps * diagf                     # (KD, D), + eps*I
    sum_w_col = moments[KD:KD + K, D:D + 1]                  # (K, 1)

    # ---- K independent (D,D) inverses + determinants ---------------------
    # Pivot-free Gauss-Jordan (cov + eps*I is SPD) on the stacked augmented
    # slab: pivot rows via a stride-D sublane read from the VMEM scratch,
    # per-block broadcast via a tiny (KD,K)x(K,2D) matmul (contraction K).
    m = jnp.concatenate([cov, diagf], axis=1)                # (KD, 2D)
    det2pi = jnp.ones((K, 1), f32)                           # det(2*pi*cov_k)
    for j in range(D):                                       # static unroll, D small
        m_ref[...] = m
        prow = m_ref[pl.ds(j, K, stride=D), :]               # (K, 2D) pivot rows
        piv = prow[:, j:j + 1]                               # (K, 1)
        det2pi = det2pi * (piv * two_pi)                     # fold (2*pi)^D in
        prow = prow * pl.reciprocal(piv, approx=False)       # exact pivot recip
        factor = m[:, j:j + 1] - diagf[:, j:j + 1]           # (KD, 1)
        m = m - jnp.dot(factor * seg, prow, preferred_element_type=f32)
    cov_inv = m[:, D:2 * D]                                  # (KD, D)

    # ---- energy: all-K Mahalanobis forms via two matmuls -----------------
    big = jnp.tile(cov_inv, (1, K)) * blkf_ref[...]          # (KD, KD) blockdiag
    g = jnp.dot(zm, big, preferred_element_type=f32)         # (N, KD)
    quad = jnp.dot(g * zm, seg, preferred_element_type=f32)  # (N, K)
    ett = -0.5 * quad
    max_val = jnp.max(jnp.maximum(ett, 0.0), axis=1, keepdims=True)
    exp_term = jnp.exp(ett - max_val)                        # (N, K)

    coef = (sum_w_col * f32(1.0 / N)) * lax.rsqrt(jnp.abs(det2pi))   # (K, 1)
    s = jnp.dot(exp_term, coef, preferred_element_type=f32)  # (N, 1)
    sample_energy = -max_val - jnp.log(s + eps)              # (N, 1)
    energy_ref[...] = jnp.sum(sample_energy, axis=(0, 1), keepdims=True)


def gmm_energy_fused(z, wlin, b2d):
    N, D = z.shape
    K = wlin.shape[0]
    KD = K * D

    # Hoisted constant selection/mask matrices (built once in the wrapper;
    # a few KB of prefetched DMA instead of in-kernel iota/compare chains).
    blk = np.arange(KD) // D
    expand = (blk[None, :] == np.arange(K)[:, None]).astype(np.float32)   # (K, KD)
    seg = np.ascontiguousarray(expand.T)                                  # (KD, K)
    diag_f = (np.arange(KD)[:, None] % D
              == np.arange(D)[None, :]).astype(np.float32)                # (KD, D)
    blk_f = (blk[:, None] == blk[None, :]).astype(np.float32)             # (KD, KD)

    flops = (2 * N * D * K                    # logits
             + 2 * N * K * KD                 # responsibility replication
             + 2 * N * (KD + K) * (D + 1)     # augmented moments matmul
             + D * (2 * KD * K * 2 * D)       # GJ per-block broadcasts
             + KD * KD                        # blockdiag assembly
             + 2 * N * KD * KD                # zm @ blockdiag(cov_inv)
             + 2 * N * KD * K                 # per-block lane reduction
             + 2 * N * K)                     # exp_term @ coef
    transcendentals = 2 * N * K + 2 * N + K + KD + D * K
    bytes_accessed = 4 * (N * D + K * D + K
                          + K * KD + KD * K + KD * D + KD * KD + 1)

    return pl.pallas_call(
        _gmm_fused_kernel,
        out_shape=jax.ShapeDtypeStruct((1, 1), jnp.float32),
        in_specs=[_vmem_spec()] * 7,
        out_specs=_vmem_spec(),
        scratch_shapes=[pltpu.VMEM((KD, 2 * D), jnp.float32)],
        cost_estimate=pl.CostEstimate(flops=flops,
                                      transcendentals=transcendentals,
                                      bytes_accessed=bytes_accessed),
    )(z, wlin, b2d,
      jnp.asarray(expand), jnp.asarray(seg),
      jnp.asarray(diag_f), jnp.asarray(blk_f))


@jax.jit
def gmm_forward(x, W, b):
    # x: (1, N, D);  W: (K, D);  b: (K,)
    z = x[0].astype(jnp.float32)
    K = W.shape[0]
    energy = gmm_energy_fused(z, W.astype(jnp.float32),
                              b.astype(jnp.float32).reshape(1, K))
    return energy[0, 0]


# Pure-JAX reference (mirrors the PyTorch module exactly) for validation.
def gmm_forward_ref(x, W, b):
    z = x[0]
    N = z.shape[0]
    cw = jax.nn.softmax(z @ W.T + b, axis=-1)                 # (N, K)
    phi = jnp.sum(cw, 0)[None, :] / N
    mu = jnp.sum(cw[:, :, None] * z[:, None, :], axis=0) / jnp.sum(cw, 0)[:, None]
    z_mu = z[:, None, :] - mu[None, :, :]                     # (N, K, D)
    z_mu_outer = z_mu[..., :, None] * z_mu[..., None, :]
    cov = (jnp.sum(cw[:, :, None, None] * z_mu_outer, axis=0)
           / jnp.sum(cw, 0)[:, None, None])
    eps = 1e-5
    K, D, _ = cov.shape
    cov_k = cov + jnp.eye(D)[None] * eps
    cov_inv = jnp.linalg.inv(cov_k)
    det_cov = jnp.abs(jnp.linalg.det(cov_k * (2 * jnp.pi)))
    ett = -0.5 * jnp.sum(
        jnp.sum(z_mu[..., None] * cov_inv[None], axis=-2) * z_mu, axis=-1)
    max_val = jnp.max(jnp.maximum(ett, 0.0), axis=1, keepdims=True)
    exp_term = jnp.exp(ett - max_val)
    sample_energy = -max_val[:, 0] - jnp.log(
        jnp.sum(phi * exp_term / jnp.sqrt(det_cov)[None, :], axis=1) + eps)
    return jnp.sum(sample_energy)


if __name__ == "__main__":
    key = jax.random.PRNGKey(0)
    N, D, K = 16, 8, 8          # seq_len, embedding_size, num_components
    kx, kw, kb = jax.random.split(key, 3)

    x = jax.random.normal(kx, (1, N, D), dtype=jnp.float32)
    bound = 1.0 / math.sqrt(D)  # deterministic Linear-style init
    W = jax.random.uniform(kw, (K, D), minval=-bound, maxval=bound,
                           dtype=jnp.float32)
    b = jax.random.uniform(kb, (K,), minval=-bound, maxval=bound,
                           dtype=jnp.float32)

    energy = jax.block_until_ready(gmm_forward(x, W, b))
    ref = jax.block_until_ready(gmm_forward_ref(x, W, b))

    assert jnp.isfinite(energy), ("non-finite energy", energy)
    assert jnp.allclose(energy, ref, rtol=1e-3, atol=1e-3), (energy, ref)
    print("KERNEL_OK")
</pallas_src>

<mosaic_0001>
module attributes {stable_mosaic.version = 11 : i64} {
  func.func @_gmm_fused_kernel(%arg0: memref<16x8xf32, #tpu.memory_space<vmem>>, %arg1: memref<8x8xf32, #tpu.memory_space<vmem>>, %arg2: memref<1x8xf32, #tpu.memory_space<vmem>>, %arg3: memref<8x64xf32, #tpu.memory_space<vmem>>, %arg4: memref<64x8xf32, #tpu.memory_space<vmem>>, %arg5: memref<64x8xf32, #tpu.memory_space<vmem>>, %arg6: memref<64x64xf32, #tpu.memory_space<vmem>>, %arg7: memref<1x1xf32, #tpu.memory_space<vmem>>, %arg8: memref<64x16xf32, #tpu.memory_space<vmem>>) attributes {dimension_semantics = [], scalar_prefetch = 0 : i64, scratch_operands = 1 : i64, tpu.core_type = #tpu.core_type<tc>} {
    %c0 = arith.constant 0 : index
    %c0_0 = arith.constant 0 : index
    %0 = vector.load %arg0[%c0, %c0_0] : memref<16x8xf32, #tpu.memory_space<vmem>>, vector<16x8xf32>
    %c0_1 = arith.constant 0 : index
    %c0_2 = arith.constant 0 : index
    %1 = vector.load %arg5[%c0_1, %c0_2] : memref<64x8xf32, #tpu.memory_space<vmem>>, vector<64x8xf32>
    %c0_3 = arith.constant 0 : index
    %c0_4 = arith.constant 0 : index
    %2 = vector.load %arg4[%c0_3, %c0_4] : memref<64x8xf32, #tpu.memory_space<vmem>>, vector<64x8xf32>
    %c0_5 = arith.constant 0 : index
    %c0_6 = arith.constant 0 : index
    %3 = vector.load %arg1[%c0_5, %c0_6] : memref<8x8xf32, #tpu.memory_space<vmem>>, vector<8x8xf32>
    "tpu.trace_start"() <{level = 10 : i32, message = "nd,kd->nk"}> : () -> ()
    %cst = arith.constant dense<0.000000e+00> : vector<16x8xf32>
    %4 = tpu.matmul %0, %3, %cst {dimension_numbers = #tpu.dot_dimension_numbers<[1], [1], [0], [0], [0, 0, 1, 0], [], []>} : vector<16x8xf32>, vector<8x8xf32>, vector<16x8xf32> -> vector<16x8xf32>
    "tpu.trace_stop"() : () -> ()
    %c0_7 = arith.constant 0 : index
    %c0_8 = arith.constant 0 : index
    %5 = vector.load %arg2[%c0_7, %c0_8] : memref<1x8xf32, #tpu.memory_space<vmem>>, vector<1x8xf32>
    %6 = vector.broadcast %5 : vector<1x8xf32> to vector<16x8xf32>
    %7 = arith.addf %4, %6 : vector<16x8xf32>
    %cst_9 = arith.constant dense<0xFF800000> : vector<16xf32>
    %8 = vector.multi_reduction <maximumf>, %7, %cst_9 [1] : vector<16x8xf32> to vector<16xf32>
    %9 = vector.shape_cast %8 : vector<16xf32> to vector<16x1xf32>
    %10 = vector.broadcast %9 : vector<16x1xf32> to vector<16x8xf32>
    %11 = arith.subf %7, %10 : vector<16x8xf32>
    %12 = math.exp %11 : vector<16x8xf32>
    %cst_10 = arith.constant dense<0.000000e+00> : vector<16xf32>
    %13 = vector.multi_reduction <add>, %12, %cst_10 [1] : vector<16x8xf32> to vector<16xf32>
    %14 = vector.shape_cast %13 : vector<16xf32> to vector<16x1xf32>
    %15 = tpu.reciprocal %14 {approx = true} : vector<16x1xf32> -> vector<16x1xf32>
    %16 = arith.mulf %14, %15 : vector<16x1xf32>
    %cst_11 = arith.constant 2.000000e+00 : f32
    %17 = vector.broadcast %cst_11 : f32 to vector<16x1xf32>
    %18 = arith.subf %17, %16 : vector<16x1xf32>
    %19 = arith.mulf %15, %18 : vector<16x1xf32>
    %20 = vector.broadcast %19 : vector<16x1xf32> to vector<16x8xf32>
    %21 = arith.mulf %12, %20 : vector<16x8xf32>
    %cst_12 = arith.constant dense<0.000000e+00> : vector<8xf32>
    %22 = vector.multi_reduction <add>, %0, %cst_12 [0] : vector<16x8xf32> to vector<8xf32>
    %23 = vector.shape_cast %22 : vector<8xf32> to vector<1x8xf32>
    %cst_13 = arith.constant 6.250000e-02 : f32
    %24 = vector.broadcast %cst_13 : f32 to vector<1x8xf32>
    %25 = arith.mulf %23, %24 : vector<1x8xf32>
    %26 = vector.broadcast %25 : vector<1x8xf32> to vector<16x8xf32>
    %27 = arith.subf %0, %26 : vector<16x8xf32>
    %c0_14 = arith.constant 0 : index
    %c0_15 = arith.constant 0 : index
    %28 = vector.load %arg3[%c0_14, %c0_15] : memref<8x64xf32, #tpu.memory_space<vmem>>, vector<8x64xf32>
    %cst_16 = arith.constant dense<0.000000e+00> : vector<16x64xf32>
    %29 = tpu.matmul %21, %28, %cst_16 {dimension_numbers = #tpu.dot_dimension_numbers<[1], [0], [0], [1], [0, 0, 1, 1], [], []>} : vector<16x8xf32>, vector<8x64xf32>, vector<16x64xf32> -> vector<16x64xf32>
    %30 = tpu.concatenate %27, %27, %27, %27, %27, %27, %27, %27 in 1 : vector<16x8xf32>, vector<16x8xf32>, vector<16x8xf32>, vector<16x8xf32>, vector<16x8xf32>, vector<16x8xf32>, vector<16x8xf32>, vector<16x8xf32> -> vector<16x64xf32>
    %cst_17 = arith.constant dense<0.000000e+00> : vector<64xf32>
    %31 = vector.multi_reduction <add>, %29, %cst_17 [0] : vector<16x64xf32> to vector<64xf32>
    %32 = vector.shape_cast %31 : vector<64xf32> to vector<1x64xf32>
    %33 = tpu.reciprocal %32 {approx = true} : vector<1x64xf32> -> vector<1x64xf32>
    %34 = arith.mulf %32, %33 : vector<1x64xf32>
    %cst_18 = arith.constant 2.000000e+00 : f32
    %35 = vector.broadcast %cst_18 : f32 to vector<1x64xf32>
    %36 = arith.subf %35, %34 : vector<1x64xf32>
    %37 = arith.mulf %33, %36 : vector<1x64xf32>
    %38 = arith.mulf %29, %30 : vector<16x64xf32>
    %cst_19 = arith.constant dense<0.000000e+00> : vector<64xf32>
    %39 = vector.multi_reduction <add>, %38, %cst_19 [0] : vector<16x64xf32> to vector<64xf32>
    %40 = vector.shape_cast %39 : vector<64xf32> to vector<1x64xf32>
    %41 = arith.mulf %40, %37 : vector<1x64xf32>
    %42 = vector.broadcast %41 : vector<1x64xf32> to vector<16x64xf32>
    %43 = arith.subf %30, %42 : vector<16x64xf32>
    %44 = vector.broadcast %37 : vector<1x64xf32> to vector<16x64xf32>
    %45 = arith.mulf %29, %44 : vector<16x64xf32>
    %46 = arith.mulf %45, %43 : vector<16x64xf32>
    %47 = tpu.concatenate %46, %21 in 1 : vector<16x64xf32>, vector<16x8xf32> -> vector<16x72xf32>
    %cst_20 = arith.constant 1.000000e+00 : f32
    %48 = vector.broadcast %cst_20 : f32 to vector<16x1xf32>
    %49 = tpu.concatenate %27, %48 in 1 : vector<16x8xf32>, vector<16x1xf32> -> vector<16x9xf32>
    "tpu.trace_start"() <{level = 10 : i32, message = "nc,nd->cd"}> : () -> ()
    %cst_21 = arith.constant dense<0.000000e+00> : vector<72x9xf32>
    %50 = tpu.matmul %47, %49, %cst_21 {dimension_numbers = #tpu.dot_dimension_numbers<[0], [0], [1], [1], [0, 1, 1, 1], [], []>} : vector<16x72xf32>, vector<16x9xf32>, vector<72x9xf32> -> vector<72x9xf32>
    "tpu.trace_stop"() : () -> ()
    %51 = vector.extract_strided_slice %50 {offsets = [0, 0], sizes = [64, 8], strides = [1, 1]} : vector<72x9xf32> to vector<64x8xf32>
    %cst_22 = arith.constant 9.99999974E-6 : f32
    %52 = vector.broadcast %cst_22 : f32 to vector<64x8xf32>
    %53 = arith.mulf %52, %1 : vector<64x8xf32>
    %54 = arith.addf %51, %53 : vector<64x8xf32>
    %55 = vector.extract_strided_slice %50 {offsets = [64, 8], sizes = [8, 1], strides = [1, 1]} : vector<72x9xf32> to vector<8x1xf32>
    %56 = tpu.concatenate %54, %1 in 1 : vector<64x8xf32>, vector<64x8xf32> -> vector<64x16xf32>
    %cst_23 = arith.constant 1.000000e+00 : f32
    %57 = vector.broadcast %cst_23 : f32 to vector<8x1xf32>
    %c0_24 = arith.constant 0 : index
    %c0_25 = arith.constant 0 : index
    %58 = vector.load %arg8[%c0_24, %c0_25] : memref<64x16xf32, #tpu.memory_space<vmem>>, vector<64x16xf32>
    tpu.vector_store %arg8[%c0_24, %c0_25], %56 {strides = array<i32>} : memref<64x16xf32, #tpu.memory_space<vmem>>, vector<64x16xf32>,
    %c0_26 = arith.constant 0 : index
    %c0_27 = arith.constant 0 : index
    %59 = tpu.strided_load %arg8[%c0_26, %c0_27] {strides = array<i32: 8, 1>} : memref<64x16xf32, #tpu.memory_space<vmem>>, vector<8x16xf32>
    %60 = vector.extract_strided_slice %59 {offsets = [0, 0], sizes = [8, 1], strides = [1, 1]} : vector<8x16xf32> to vector<8x1xf32>
    %cst_28 = arith.constant 6.28318548 : f32
    %61 = vector.broadcast %cst_28 : f32 to vector<8x1xf32>
    %62 = arith.mulf %60, %61 : vector<8x1xf32>
    %63 = arith.mulf %57, %62 : vector<8x1xf32>
    %64 = tpu.reciprocal %60 : vector<8x1xf32> -> vector<8x1xf32>
    %65 = vector.broadcast %64 : vector<8x1xf32> to vector<8x16xf32>
    %66 = arith.mulf %59, %65 : vector<8x16xf32>
    %67 = vector.extract_strided_slice %56 {offsets = [0, 0], sizes = [64, 1], strides = [1, 1]} : vector<64x16xf32> to vector<64x1xf32>
    %68 = vector.extract_strided_slice %1 {offsets = [0, 0], sizes = [64, 1], strides = [1, 1]} : vector<64x8xf32> to vector<64x1xf32>
    %69 = arith.subf %67, %68 : vector<64x1xf32>
    %70 = vector.broadcast %69 : vector<64x1xf32> to vector<64x8xf32>
    %71 = arith.mulf %70, %2 : vector<64x8xf32>
    %cst_29 = arith.constant dense<0.000000e+00> : vector<64x16xf32>
    %72 = tpu.matmul %71, %66, %cst_29 {dimension_numbers = #tpu.dot_dimension_numbers<[1], [0], [0], [1], [0, 0, 1, 1], [], []>} : vector<64x8xf32>, vector<8x16xf32>, vector<64x16xf32> -> vector<64x16xf32>
    %73 = arith.subf %56, %72 : vector<64x16xf32>
    %c0_30 = arith.constant 0 : index
    %c0_31 = arith.constant 0 : index
    %74 = vector.load %arg8[%c0_30, %c0_31] : memref<64x16xf32, #tpu.memory_space<vmem>>, vector<64x16xf32>
    tpu.vector_store %arg8[%c0_30, %c0_31], %73 {strides = array<i32>} : memref<64x16xf32, #tpu.memory_space<vmem>>, vector<64x16xf32>,
    %c1 = arith.constant 1 : index
    %c0_32 = arith.constant 0 : index
    %75 = tpu.strided_load %arg8[%c1, %c0_32] {strides = array<i32: 8, 1>} : memref<64x16xf32, #tpu.memory_space<vmem>>, vector<8x16xf32>
    %76 = vector.extract_strided_slice %75 {offsets = [0, 1], sizes = [8, 1], strides = [1, 1]} : vector<8x16xf32> to vector<8x1xf32>
    %cst_33 = arith.constant 6.28318548 : f32
    %77 = vector.broadcast %cst_33 : f32 to vector<8x1xf32>
    %78 = arith.mulf %76, %77 : vector<8x1xf32>
    %79 = arith.mulf %63, %78 : vector<8x1xf32>
    %80 = tpu.reciprocal %76 : vector<8x1xf32> -> vector<8x1xf32>
    %81 = vector.broadcast %80 : vector<8x1xf32> to vector<8x16xf32>
    %82 = arith.mulf %75, %81 : vector<8x16xf32>
    %83 = vector.extract_strided_slice %73 {offsets = [0, 1], sizes = [64, 1], strides = [1, 1]} : vector<64x16xf32> to vector<64x1xf32>
    %84 = vector.extract_strided_slice %1 {offsets = [0, 1], sizes = [64, 1], strides = [1, 1]} : vector<64x8xf32> to vector<64x1xf32>
    %85 = arith.subf %83, %84 : vector<64x1xf32>
    %86 = vector.broadcast %85 : vector<64x1xf32> to vector<64x8xf32>
    %87 = arith.mulf %86, %2 : vector<64x8xf32>
    %cst_34 = arith.constant dense<0.000000e+00> : vector<64x16xf32>
    %88 = tpu.matmul %87, %82, %cst_34 {dimension_numbers = #tpu.dot_dimension_numbers<[1], [0], [0], [1], [0, 0, 1, 1], [], []>} : vector<64x8xf32>, vector<8x16xf32>, vector<64x16xf32> -> vector<64x16xf32>
    %89 = arith.subf %73, %88 : vector<64x16xf32>
    %c0_35 = arith.constant 0 : index
    %c0_36 = arith.constant 0 : index
    %90 = vector.load %arg8[%c0_35, %c0_36] : memref<64x16xf32, #tpu.memory_space<vmem>>, vector<64x16xf32>
    tpu.vector_store %arg8[%c0_35, %c0_36], %89 {strides = array<i32>} : memref<64x16xf32, #tpu.memory_space<vmem>>, vector<64x16xf32>,
    %c2 = arith.constant 2 : index
    %c0_37 = arith.constant 0 : index
    %91 = tpu.strided_load %arg8[%c2, %c0_37] {strides = array<i32: 8, 1>} : memref<64x16xf32, #tpu.memory_space<vmem>>, vector<8x16xf32>
    %92 = vector.extract_strided_slice %91 {offsets = [0, 2], sizes = [8, 1], strides = [1, 1]} : vector<8x16xf32> to vector<8x1xf32>
    %cst_38 = arith.constant 6.28318548 : f32
    %93 = vector.broadcast %cst_38 : f32 to vector<8x1xf32>
    %94 = arith.mulf %92, %93 : vector<8x1xf32>
    %95 = arith.mulf %79, %94 : vector<8x1xf32>
    %96 = tpu.reciprocal %92 : vector<8x1xf32> -> vector<8x1xf32>
    %97 = vector.broadcast %96 : vector<8x1xf32> to vector<8x16xf32>
    %98 = arith.mulf %91, %97 : vector<8x16xf32>
    %99 = vector.extract_strided_slice %89 {offsets = [0, 2], sizes = [64, 1], strides = [1, 1]} : vector<64x16xf32> to vector<64x1xf32>
    %100 = vector.extract_strided_slice %1 {offsets = [0, 2], sizes = [64, 1], strides = [1, 1]} : vector<64x8xf32> to vector<64x1xf32>
    %101 = arith.subf %99, %100 : vector<64x1xf32>
    %102 = vector.broadcast %101 : vector<64x1xf32> to vector<64x8xf32>
    %103 = arith.mulf %102, %2 : vector<64x8xf32>
    %cst_39 = arith.constant dense<0.000000e+00> : vector<64x16xf32>
    %104 = tpu.matmul %103, %98, %cst_39 {dimension_numbers = #tpu.dot_dimension_numbers<[1], [0], [0], [1], [0, 0, 1, 1], [], []>} : vector<64x8xf32>, vector<8x16xf32>, vector<64x16xf32> -> vector<64x16xf32>
    %105 = arith.subf %89, %104 : vector<64x16xf32>
    %c0_40 = arith.constant 0 : index
    %c0_41 = arith.constant 0 : index
    %106 = vector.load %arg8[%c0_40, %c0_41] : memref<64x16xf32, #tpu.memory_space<vmem>>, vector<64x16xf32>
    tpu.vector_store %arg8[%c0_40, %c0_41], %105 {strides = array<i32>} : memref<64x16xf32, #tpu.memory_space<vmem>>, vector<64x16xf32>,
    %c3 = arith.constant 3 : index
    %c0_42 = arith.constant 0 : index
    %107 = tpu.strided_load %arg8[%c3, %c0_42] {strides = array<i32: 8, 1>} : memref<64x16xf32, #tpu.memory_space<vmem>>, vector<8x16xf32>
    %108 = vector.extract_strided_slice %107 {offsets = [0, 3], sizes = [8, 1], strides = [1, 1]} : vector<8x16xf32> to vector<8x1xf32>
    %cst_43 = arith.constant 6.28318548 : f32
    %109 = vector.broadcast %cst_43 : f32 to vector<8x1xf32>
    %110 = arith.mulf %108, %109 : vector<8x1xf32>
    %111 = arith.mulf %95, %110 : vector<8x1xf32>
    %112 = tpu.reciprocal %108 : vector<8x1xf32> -> vector<8x1xf32>
    %113 = vector.broadcast %112 : vector<8x1xf32> to vector<8x16xf32>
    %114 = arith.mulf %107, %113 : vector<8x16xf32>
    %115 = vector.extract_strided_slice %105 {offsets = [0, 3], sizes = [64, 1], strides = [1, 1]} : vector<64x16xf32> to vector<64x1xf32>
    %116 = vector.extract_strided_slice %1 {offsets = [0, 3], sizes = [64, 1], strides = [1, 1]} : vector<64x8xf32> to vector<64x1xf32>
    %117 = arith.subf %115, %116 : vector<64x1xf32>
    %118 = vector.broadcast %117 : vector<64x1xf32> to vector<64x8xf32>
    %119 = arith.mulf %118, %2 : vector<64x8xf32>
    %cst_44 = arith.constant dense<0.000000e+00> : vector<64x16xf32>
    %120 = tpu.matmul %119, %114, %cst_44 {dimension_numbers = #tpu.dot_dimension_numbers<[1], [0], [0], [1], [0, 0, 1, 1], [], []>} : vector<64x8xf32>, vector<8x16xf32>, vector<64x16xf32> -> vector<64x16xf32>
    %121 = arith.subf %105, %120 : vector<64x16xf32>
    %c0_45 = arith.constant 0 : index
    %c0_46 = arith.constant 0 : index
    %122 = vector.load %arg8[%c0_45, %c0_46] : memref<64x16xf32, #tpu.memory_space<vmem>>, vector<64x16xf32>
    tpu.vector_store %arg8[%c0_45, %c0_46], %121 {strides = array<i32>} : memref<64x16xf32, #tpu.memory_space<vmem>>, vector<64x16xf32>,
    %c4 = arith.constant 4 : index
    %c0_47 = arith.constant 0 : index
    %123 = tpu.strided_load %arg8[%c4, %c0_47] {strides = array<i32: 8, 1>} : memref<64x16xf32, #tpu.memory_space<vmem>>, vector<8x16xf32>
    %124 = vector.extract_strided_slice %123 {offsets = [0, 4], sizes = [8, 1], strides = [1, 1]} : vector<8x16xf32> to vector<8x1xf32>
    %cst_48 = arith.constant 6.28318548 : f32
    %125 = vector.broadcast %cst_48 : f32 to vector<8x1xf32>
    %126 = arith.mulf %124, %125 : vector<8x1xf32>
    %127 = arith.mulf %111, %126 : vector<8x1xf32>
    %128 = tpu.reciprocal %124 : vector<8x1xf32> -> vector<8x1xf32>
    %129 = vector.broadcast %128 : vector<8x1xf32> to vector<8x16xf32>
    %130 = arith.mulf %123, %129 : vector<8x16xf32>
    %131 = vector.extract_strided_slice %121 {offsets = [0, 4], sizes = [64, 1], strides = [1, 1]} : vector<64x16xf32> to vector<64x1xf32>
    %132 = vector.extract_strided_slice %1 {offsets = [0, 4], sizes = [64, 1], strides = [1, 1]} : vector<64x8xf32> to vector<64x1xf32>
    %133 = arith.subf %131, %132 : vector<64x1xf32>
    %134 = vector.broadcast %133 : vector<64x1xf32> to vector<64x8xf32>
    %135 = arith.mulf %134, %2 : vector<64x8xf32>
    %cst_49 = arith.constant dense<0.000000e+00> : vector<64x16xf32>
    %136 = tpu.matmul %135, %130, %cst_49 {dimension_numbers = #tpu.dot_dimension_numbers<[1], [0], [0], [1], [0, 0, 1, 1], [], []>} : vector<64x8xf32>, vector<8x16xf32>, vector<64x16xf32> -> vector<64x16xf32>
    %137 = arith.subf %121, %136 : vector<64x16xf32>
    %c0_50 = arith.constant 0 : index
    %c0_51 = arith.constant 0 : index
    %138 = vector.load %arg8[%c0_50, %c0_51] : memref<64x16xf32, #tpu.memory_space<vmem>>, vector<64x16xf32>
    tpu.vector_store %arg8[%c0_50, %c0_51], %137 {strides = array<i32>} : memref<64x16xf32, #tpu.memory_space<vmem>>, vector<64x16xf32>,
    %c5 = arith.constant 5 : index
    %c0_52 = arith.constant 0 : index
    %139 = tpu.strided_load %arg8[%c5, %c0_52] {strides = array<i32: 8, 1>} : memref<64x16xf32, #tpu.memory_space<vmem>>, vector<8x16xf32>
    %140 = vector.extract_strided_slice %139 {offsets = [0, 5], sizes = [8, 1], strides = [1, 1]} : vector<8x16xf32> to vector<8x1xf32>
    %cst_53 = arith.constant 6.28318548 : f32
    %141 = vector.broadcast %cst_53 : f32 to vector<8x1xf32>
    %142 = arith.mulf %140, %141 : vector<8x1xf32>
    %143 = arith.mulf %127, %142 : vector<8x1xf32>
    %144 = tpu.reciprocal %140 : vector<8x1xf32> -> vector<8x1xf32>
    %145 = vector.broadcast %144 : vector<8x1xf32> to vector<8x16xf32>
    %146 = arith.mulf %139, %145 : vector<8x16xf32>
    %147 = vector.extract_strided_slice %137 {offsets = [0, 5], sizes = [64, 1], strides = [1, 1]} : vector<64x16xf32> to vector<64x1xf32>
    %148 = vector.extract_strided_slice %1 {offsets = [0, 5], sizes = [64, 1], strides = [1, 1]} : vector<64x8xf32> to vector<64x1xf32>
    %149 = arith.subf %147, %148 : vector<64x1xf32>
    %150 = vector.broadcast %149 : vector<64x1xf32> to vector<64x8xf32>
    %151 = arith.mulf %150, %2 : vector<64x8xf32>
    %cst_54 = arith.constant dense<0.000000e+00> : vector<64x16xf32>
    %152 = tpu.matmul %151, %146, %cst_54 {dimension_numbers = #tpu.dot_dimension_numbers<[1], [0], [0], [1], [0, 0, 1, 1], [], []>} : vector<64x8xf32>, vector<8x16xf32>, vector<64x16xf32> -> vector<64x16xf32>
    %153 = arith.subf %137, %152 : vector<64x16xf32>
    %c0_55 = arith.constant 0 : index
    %c0_56 = arith.constant 0 : index
    %154 = vector.load %arg8[%c0_55, %c0_56] : memref<64x16xf32, #tpu.memory_space<vmem>>, vector<64x16xf32>
    tpu.vector_store %arg8[%c0_55, %c0_56], %153 {strides = array<i32>} : memref<64x16xf32, #tpu.memory_space<vmem>>, vector<64x16xf32>,
    %c6 = arith.constant 6 : index
    %c0_57 = arith.constant 0 : index
    %155 = tpu.strided_load %arg8[%c6, %c0_57] {strides = array<i32: 8, 1>} : memref<64x16xf32, #tpu.memory_space<vmem>>, vector<8x16xf32>
    %156 = vector.extract_strided_slice %155 {offsets = [0, 6], sizes = [8, 1], strides = [1, 1]} : vector<8x16xf32> to vector<8x1xf32>
    %cst_58 = arith.constant 6.28318548 : f32
    %157 = vector.broadcast %cst_58 : f32 to vector<8x1xf32>
    %158 = arith.mulf %156, %157 : vector<8x1xf32>
    %159 = arith.mulf %143, %158 : vector<8x1xf32>
    %160 = tpu.reciprocal %156 : vector<8x1xf32> -> vector<8x1xf32>
    %161 = vector.broadcast %160 : vector<8x1xf32> to vector<8x16xf32>
    %162 = arith.mulf %155, %161 : vector<8x16xf32>
    %163 = vector.extract_strided_slice %153 {offsets = [0, 6], sizes = [64, 1], strides = [1, 1]} : vector<64x16xf32> to vector<64x1xf32>
    %164 = vector.extract_strided_slice %1 {offsets = [0, 6], sizes = [64, 1], strides = [1, 1]} : vector<64x8xf32> to vector<64x1xf32>
    %165 = arith.subf %163, %164 : vector<64x1xf32>
    %166 = vector.broadcast %165 : vector<64x1xf32> to vector<64x8xf32>
    %167 = arith.mulf %166, %2 : vector<64x8xf32>
    %cst_59 = arith.constant dense<0.000000e+00> : vector<64x16xf32>
    %168 = tpu.matmul %167, %162, %cst_59 {dimension_numbers = #tpu.dot_dimension_numbers<[1], [0], [0], [1], [0, 0, 1, 1], [], []>} : vector<64x8xf32>, vector<8x16xf32>, vector<64x16xf32> -> vector<64x16xf32>
    %169 = arith.subf %153, %168 : vector<64x16xf32>
    %c0_60 = arith.constant 0 : index
    %c0_61 = arith.constant 0 : index
    %170 = vector.load %arg8[%c0_60, %c0_61] : memref<64x16xf32, #tpu.memory_space<vmem>>, vector<64x16xf32>
    tpu.vector_store %arg8[%c0_60, %c0_61], %169 {strides = array<i32>} : memref<64x16xf32, #tpu.memory_space<vmem>>, vector<64x16xf32>,
    %c7 = arith.constant 7 : index
    %c0_62 = arith.constant 0 : index
    %171 = tpu.strided_load %arg8[%c7, %c0_62] {strides = array<i32: 8, 1>} : memref<64x16xf32, #tpu.memory_space<vmem>>, vector<8x16xf32>
    %172 = vector.extract_strided_slice %171 {offsets = [0, 7], sizes = [8, 1], strides = [1, 1]} : vector<8x16xf32> to vector<8x1xf32>
    %cst_63 = arith.constant 6.28318548 : f32
    %173 = vector.broadcast %cst_63 : f32 to vector<8x1xf32>
    %174 = arith.mulf %172, %173 : vector<8x1xf32>
    %175 = arith.mulf %159, %174 : vector<8x1xf32>
    %176 = tpu.reciprocal %172 : vector<8x1xf32> -> vector<8x1xf32>
    %177 = vector.broadcast %176 : vector<8x1xf32> to vector<8x16xf32>
    %178 = arith.mulf %171, %177 : vector<8x16xf32>
    %179 = vector.extract_strided_slice %169 {offsets = [0, 7], sizes = [64, 1], strides = [1, 1]} : vector<64x16xf32> to vector<64x1xf32>
    %180 = vector.extract_strided_slice %1 {offsets = [0, 7], sizes = [64, 1], strides = [1, 1]} : vector<64x8xf32> to vector<64x1xf32>
    %181 = arith.subf %179, %180 : vector<64x1xf32>
    %182 = vector.broadcast %181 : vector<64x1xf32> to vector<64x8xf32>
    %183 = arith.mulf %182, %2 : vector<64x8xf32>
    %cst_64 = arith.constant dense<0.000000e+00> : vector<64x16xf32>
    %184 = tpu.matmul %183, %178, %cst_64 {dimension_numbers = #tpu.dot_dimension_numbers<[1], [0], [0], [1], [0, 0, 1, 1], [], []>} : vector<64x8xf32>, vector<8x16xf32>, vector<64x16xf32> -> vector<64x16xf32>
    %185 = arith.subf %169, %184 : vector<64x16xf32>
    %186 = vector.extract_strided_slice %185 {offsets = [0, 8], sizes = [64, 8], strides = [1, 1]} : vector<64x16xf32> to vector<64x8xf32>
    %187 = tpu.concatenate %186, %186, %186, %186, %186, %186, %186, %186 in 1 : vector<64x8xf32>, vector<64x8xf32>, vector<64x8xf32>, vector<64x8xf32>, vector<64x8xf32>, vector<64x8xf32>, vector<64x8xf32>, vector<64x8xf32> -> vector<64x64xf32>
    %c0_65 = arith.constant 0 : index
    %c0_66 = arith.constant 0 : index
    %188 = vector.load %arg6[%c0_65, %c0_66] : memref<64x64xf32, #tpu.memory_space<vmem>>, vector<64x64xf32>
    %189 = arith.mulf %187, %188 : vector<64x64xf32>
    %cst_67 = arith.constant dense<0.000000e+00> : vector<16x64xf32>
    %190 = tpu.matmul %43, %189, %cst_67 {dimension_numbers = #tpu.dot_dimension_numbers<[1], [0], [0], [1], [0, 0, 1, 1], [], []>} : vector<16x64xf32>, vector<64x64xf32>, vector<16x64xf32> -> vector<16x64xf32>
    %191 = arith.mulf %190, %43 : vector<16x64xf32>
    %cst_68 = arith.constant dense<0.000000e+00> : vector<16x8xf32>
    %192 = tpu.matmul %191, %2, %cst_68 {dimension_numbers = #tpu.dot_dimension_numbers<[1], [0], [0], [1], [0, 0, 1, 1], [], []>} : vector<16x64xf32>, vector<64x8xf32>, vector<16x8xf32> -> vector<16x8xf32>
    %cst_69 = arith.constant -5.000000e-01 : f32
    %193 = vector.broadcast %cst_69 : f32 to vector<16x8xf32>
    %194 = arith.mulf %193, %192 : vector<16x8xf32>
    %cst_70 = arith.constant 0.000000e+00 : f32
    %195 = vector.broadcast %cst_70 : f32 to vector<16x8xf32>
    %196 = arith.maximumf %194, %195 : vector<16x8xf32>
    %cst_71 = arith.constant dense<0xFF800000> : vector<16xf32>
    %197 = vector.multi_reduction <maximumf>, %196, %cst_71 [1] : vector<16x8xf32> to vector<16xf32>
    %198 = vector.shape_cast %197 : vector<16xf32> to vector<16x1xf32>
    %199 = vector.broadcast %198 : vector<16x1xf32> to vector<16x8xf32>
    %200 = arith.subf %194, %199 : vector<16x8xf32>
    %201 = math.exp %200 : vector<16x8xf32>
    %cst_72 = arith.constant 6.250000e-02 : f32
    %202 = vector.broadcast %cst_72 : f32 to vector<8x1xf32>
    %203 = arith.mulf %55, %202 : vector<8x1xf32>
    %204 = math.absf %175 : vector<8x1xf32>
    %205 = math.rsqrt %204 : vector<8x1xf32>
    %206 = arith.mulf %203, %205 : vector<8x1xf32>
    %cst_73 = arith.constant dense<0.000000e+00> : vector<16x1xf32>
    %207 = tpu.matmul %201, %206, %cst_73 {dimension_numbers = #tpu.dot_dimension_numbers<[1], [0], [0], [1], [0, 0, 1, 1], [], []>} : vector<16x8xf32>, vector<8x1xf32>, vector<16x1xf32> -> vector<16x1xf32>
    %cst_74 = arith.constant 0.000000e+00 : f32
    %208 = vector.broadcast %cst_74 : f32 to vector<16x1xf32>
    %209 = arith.subf %208, %198 : vector<16x1xf32>
    %cst_75 = arith.constant 9.99999974E-6 : f32
    %210 = vector.broadcast %cst_75 : f32 to vector<16x1xf32>
    %211 = arith.addf %207, %210 : vector<16x1xf32>
    %212 = math.log %211 : vector<16x1xf32>
    %213 = arith.subf %209, %212 : vector<16x1xf32>
    %214 = vector.shape_cast %213 : vector<16x1xf32> to vector<1x16x1xf32>
    %cst_76 = arith.constant dense<0.000000e+00> : vector<1xf32>
    %215 = vector.multi_reduction <add>, %214, %cst_76 [1, 2] : vector<1x16x1xf32> to vector<1xf32>
    %216 = vector.shape_cast %215 : vector<1xf32> to vector<1x1x1xf32>
    %217 = vector.extract %216[0, 0, 0] : f32 from vector<1x1x1xf32>
    %218 = vector.broadcast %217 : f32 to vector<1x1xf32>
    %c0_77 = arith.constant 0 : index
    %c0_78 = arith.constant 0 : index
    %219 = vector.load %arg7[%c0_77, %c0_78] : memref<1x1xf32, #tpu.memory_space<vmem>>, vector<1x1xf32>
    tpu.vector_store %arg7[%c0_77, %c0_78], %218 {strides = array<i32>} : memref<1x1xf32, #tpu.memory_space<vmem>>, vector<1x1xf32>,
    return
  }
}

</mosaic_0001>

<bundles_post_ra>
// kernel: gmm_forward.1
= control target key start
LH: loop header
LB: loop body
LE: loop exit
PB: predicated region body
PF: predicated region fallthrough
CT: control target
= control target key end

     0   :  { %12 = vsyncpa [#allocation4], 0  ;;  %s4735_s0 = inlined_call_operand.vmem [shape: f32[16,8], index: 0, kind: input, shape index: {}]   ;;  %s4736_s1 = inlined_call_operand.vmem [shape: f32[8,8], index: 1, kind: input, shape index: {}]   ;;  %s4737_s2 = inlined_call_operand.vmem [shape: f32[1,8], index: 2, kind: input, shape index: {}]   ;;  %s4738_s3 = inlined_call_operand.vmem [shape: f32[8,64], index: 3, kind: input, shape index: {}]   ;;  %s4739_s4 = inlined_call_operand.hbm [shape: f32[64,8], index: 4, kind: input, shape index: {}]   ;;  %s4740_s5 = inlined_call_operand.hbm [shape: f32[64,8], index: 5, kind: input, shape index: {}]   ;;  %s4741_s6 = inlined_call_operand.hbm [shape: f32[64,64], index: 6, kind: input, shape index: {}]   ;;  %s4742_s7 = inlined_call_operand.hbm [shape: f32[1,1], index: 7, kind: output, shape index: {}]  }
   0x1   :  { %13 = vsyncpa [#allocation7], 0 }
   0x2   :  { %14 = vsyncpa [#allocation5], 0  ;;  %s3554_s24 = smov [#allocation6]   ;;  %s3555_s26 = smov [#allocation3]  }
   0x3   :  { %s40_s25 = sshll.u32 %s3554_s24, 4  ;;  %s28_s27 = sshll.u32 %s3555_s26, 4  ;;  %s41_s25 = int_to_ptr.vmem [resolvable:$true] %s40_s25  ;;  %s3626_s27 = int_to_ptr.vmem [resolvable:$true] %s28_s27 }
   0x4   :  { %s3460_s30 = scalar_lea.hbm %s4740_s5, 1024 }
   0x5   :  { %p3461_p0 = scmp.ne.s32.totalorder %s4740_s5, %s3460_s30  ;;  %p3464_p1 = scmp.lt.u32.totalorder %s3460_s30, %s4740_s5 }
   0x7   :  { %p3466_p2 = pnand %p3464_p1, %p3461_p0 }
   0x9   :  { %3469 = shalt.err (!%p3466_p2)
}
   0xa   :  { %s3470_s12 = scalar_lea.vmem %s41_s25, 1024  ;;  %p3475_p4 = scmp.lt.s32.totalorder %s41_s25, %s41_s25 }
   0xb   :  { %p3471_p3 = scmp.ne.s32.totalorder %s41_s25, %s3470_s12  ;;  %p3476_p5 = scmp.lt.s32.totalorder %s3470_s12, %s3470_s12 }
   0xd   :  { %p3477_p6 = por %p3476_p5, %p3475_p4 }
   0xf   :  { %p3478_p7 = pnand %p3477_p6, %p3471_p3 }
  0x11   :  { %3481 = shalt.err (!%p3478_p7)
}
  0x12   :  { %s3556_s13 = smov 128   ;;  %s3557_s14 = smov 8  }
  0x13   :  { %46 = dma.hbm_to_vmem [thread:$0]  %s4740_s5, 1024, %s41_s25, [#allocation7], %s3556_s13, %s3556_s13, %s3557_s14  }
  0x14   :  { %s3482_s19 = scalar_lea.hbm %s4739_s4, 1024 }
  0x15   :  { %p3483_p8 = scmp.ne.s32.totalorder %s4739_s4, %s3482_s19  ;;  %p3486_p9 = scmp.lt.u32.totalorder %s3482_s19, %s4739_s4 }
  0x17   :  { %p3488_p10 = pnand %p3486_p9, %p3483_p8 }
  0x19   :  { %3491 = shalt.err (!%p3488_p10)
}
  0x1a   :  { %s3492_s24 = scalar_lea.vmem %s3626_s27, 1024  ;;  %p3497_p12 = scmp.lt.s32.totalorder %s3626_s27, %s3626_s27 }
  0x1b   :  { %p3493_p11 = scmp.ne.s32.totalorder %s3626_s27, %s3492_s24  ;;  %p3498_p13 = scmp.lt.s32.totalorder %s3492_s24, %s3492_s24 }
  0x1d   :  { %p3499_p0 = por %p3498_p13, %p3497_p12 }
  0x1f   :  { %p3500_p1 = pnand %p3499_p0, %p3493_p11 }
  0x21   :  { %3503 = shalt.err (!%p3500_p1)
}
  0x22   :  { %34 = dma.hbm_to_vmem [thread:$0]  %s4739_s4, 1024, %s3626_s27, [#allocation4], %s3556_s13, %s3556_s13, %s3557_s14  }
  0x23   :  { %s3558_s26 = smov [#allocation8]   ;;  %s3504_s8 = scalar_lea.hbm %s4741_s6, 1024 }
  0x24   :  { %s52_s28 = sshll.u32 %s3558_s26, 4  ;;  %p3505_p2 = scmp.ne.s32.totalorder %s4741_s6, %s3504_s8  ;;  %s53_s28 = int_to_ptr.vmem [resolvable:$true] %s52_s28 }
  0x25   :  { %p3508_p3 = scmp.lt.u32.totalorder %s3504_s8, %s4741_s6 }
  0x27   :  { %p3510_p4 = pnand %p3508_p3, %p3505_p2 }
  0x29   :  { %3513 = shalt.err (!%p3510_p4)
}
  0x2a   :  { %s3514_s15 = scalar_lea.vmem %s53_s28, 1024  ;;  %p3519_p6 = scmp.lt.s32.totalorder %s53_s28, %s53_s28 }
  0x2b   :  { %p3515_p5 = scmp.ne.s32.totalorder %s53_s28, %s3514_s15  ;;  %p3520_p7 = scmp.lt.s32.totalorder %s3514_s15, %s3514_s15 }
  0x2d   :  { %p3521_p8 = por %p3520_p7, %p3519_p6 }
  0x2f   :  { %p3522_p9 = pnand %p3521_p8, %p3515_p5 }
  0x31   :  { %3525 = shalt.err (!%p3522_p9)
}
  0x32   :  { %58 = dma.hbm_to_vmem [thread:$0]  %s4741_s6, 1024, %s53_s28, [#allocation7], %s3556_s13, %s3556_s13, %s3557_s14  }
  0x33   :  { %3548 = dma.done.wait [#allocation4], 1024  }
  0x34   :  { %3549 = vsyncadd [#allocation4], 4294966272 }
  0x35   :  { %3550 = dma.done.wait [#allocation7], 2048  }
  0x36   :  { %3551 = vsyncadd [#allocation7], 4294965248  ;;  %vm94_vm0 = vcmask 64512   ;;  %v86_v0 = vld [vmem:[%s4736_s1] sm:$0xff]  ;;  %v69_v2 = vld [vmem:[%s4735_s0 + $0x8] sm:$0xff]  ;;  %s3559_s6 = smov 24  }
  0x37   :  { %v68_v1 = vld [vmem:[%s4735_s0] sm:$0xff]  ;;  %3128 = vmatprep.subr.msk.mxu0 %vm94_vm0, %v86_v0  ;;  %v208_v4 = vsel %vm94_vm0, %v69_v2, 0.0  ;;  %s3561_s13 = smov 40   ;;  %s3562_s22 = smov 16   ;;  %v3566_v47 = vmov 0.0|0.0   ;;  %vm3567_vm1 = vmmov 0  }
  0x38   :  { %3130 = vmatprep.mubr.msk.f32.mxu0 %vm94_vm0, %v68_v1  ;;  %v207_v3 = vsel %vm94_vm0, %v68_v1, 0.0  ;;  %3129 = vmatpush3.xpose.msk.msra.mxu0 %vm94_vm0, %v86_v0  ;;  %v2931_v15 = vld [vmem:[%s4737_s2] ss:$0 sm:$0xff]  ;;  %s3560_s2 = smov 32   ;;  %s3563_s23 = smov 48   ;;  %v3568_v49 = vmov 0.0  }
  0x39   :  { %v209_v5 = vadd.f32 %v208_v4, %v207_v3  ;;  %s3564_s24 = smov 56   ;;  %v219_v32 = vld [vmem:[%s4738_s3] sm:$0xff]  ;;  %s3565_s3 = smov 64   ;;  %vm347_vm2 = vcmask 130048   ;;  %vm350_vm3 = vcmask 195584   ;;  %vm353_vm4 = vcmask 261120  }
  0x3a   :  { %3133 = vmatprep.subr.mxu1 %v219_v32  ;;  %vm356_vm5 = vcmask 326656   ;;  %vm359_vm6 = vcmask 392192   ;;  %vm362_vm7 = vcmask 457728   ;;  %vm365_vm8 = vcmask 523264   ;;  %s3577_s26 = smov 120   ;;  %s3578_s28 = smov 126  }
  0x3b   :  { %v210_v6 = vrot.slane %v209_v5, 4  ;;  %3131 = vmatmul.mubr.msk.f32.vlgmr.msra.gmra.mrb[0].mxu0 %vm94_vm0, %v69_v2  ;;  %3134 = vmatpush3.msra.mxu1 %v219_v32  ;;  %s3579_s29 = smov 127   ;;  %s3580_s30 = smov 124   ;;  %vm2899_vm9 = vcmask 7168   ;;  %vm2913_vm10 = vcmask 0  }
  0x3c   :  { %3324 = vmatprep.subr.bf16.mxu1 %v3566_v47  ;;  %s3581_s8 = smov 125   ;;  %s3582_s9 = smov 122  }
  0x3d   :  { %v211_v7 = vadd.f32 %v210_v6, %v209_v5  ;;  %s3583_s10 = smov 123   ;;  %s3584_s11 = smov 121  }
  0x3f   :  { %v212_v8 = vrot.slane %v211_v7, 2 }
  0x41   :  { %v213_v9 = vadd.f32 %v212_v8, %v211_v7 }
  0x43   :  { %v214_v10 = vrot.slane %v213_v9, 1 }
  0x45   :  { %v215_v11 = vadd.f32 %v214_v10, %v213_v9 }
  0x47   :  { %v216_v12 = vmul.f32 0.0625, %v215_v11 }
  0x49   :  { %v3693_v13 = vsub.f32 %v68_v1, %v216_v12  ;;  %v3695_v14 = vsub.f32 %v69_v2, %v216_v12 }
  0x4b   :  { %v405_v45 = vsel %vm94_vm0, %v3693_v13, 1.0  ;;  %v406_v46 = vsel %vm94_vm0, %v3695_v14, 1.0 }
  0x4c   :  { %v3325_v48 = vpack.c.bf16 %v406_v46, %v405_v45 }
 0x10e   :  { %v3132_v16 = vpop.f32.mrb[0].mxu0 }
 0x10f   :  { %v170_v17 = vpop.f32.mrb[1].mxu0  ;;  %v176_v19 = vadd.f32 %v3132_v16, %v2931_v15 }
 0x110   :  { %v171_v18 = vadd.f32 %v2931_v15, %v170_v17 }
 0x111   :  { %v182_v21 = vsel %vm94_vm0, %v176_v19, -inf }
 0x112   :  { %v179_v20 = vsel %vm94_vm0, %v171_v18, -inf }
 0x113   :  { %180 = vmax.xlane.f32.xlu0 %v179_v20 }
 0x117   :  { %183 = vmax.xlane.f32.xlu0 %v182_v21 }
 0x12d   :  { %303 = vrot.lane.b32.xlu0 %v3693_v13, %s3557_s14 }
 0x131   :  { %315 = vrot.lane.b32.xlu0 %v3693_v13, %s3559_s6 }
 0x135   :  { %321 = vrot.lane.b32.xlu0 %v3693_v13, %s3560_s2 }
 0x139   :  { %327 = vrot.lane.b32.xlu0 %v3693_v13, %s3561_s13 }
 0x13d   :  { %333 = vrot.lane.b32.xlu0 %v3693_v13, %s3563_s23 }
 0x141   :  { %339 = vrot.lane.b32.xlu0 %v3693_v13, %s3564_s24 }
 0x1a0   :  { %v181_v22 = vpop.xlane.xlu0 %180 }
 0x1a1   :  { %v185_v23 = vsub.f32 %v171_v18, %v181_v22 }
 0x1a3   :  { %v187_v24 = vmul.f32 1.442695, %v185_v23 }
 0x1a4   :  { %v184_v25 = vpop.xlane.xlu0 %183 }
 0x1a5   :  { %3408 = vpow2.f32 %v187_v24  ;;  %v186_v26 = vsub.f32 %v176_v19, %v184_v25 }
 0x1a7   :  { %v189_v27 = vmul.f32 1.442695, %v186_v26 }
 0x1a8   :  { %v304_v53 = vpop.permute.xlu0 %303 }
 0x1a9   :  { %3410 = vpow2.f32 %v189_v27  ;;  %v345_v59 = vsel %vm94_vm0, %v3693_v13, %v304_v53  ;;  %v3773_v53 = vld [vmem:[#allocation6 + $0x8] sm:$0xff] }
 0x1ac   :  { %v316_v55 = vpop.permute.xlu0 %315 }
 0x1af   :  { %v3409_v28 = vpop.eup %3408 }
 0x1b0   :  { %v191_v29 = vsel %vm94_vm0, %v3409_v28, 0.0  ;;  %v322_v58 = vpop.permute.xlu0 %321 }
 0x1b1   :  { %192 = vadd.xlane.f32.xlu1 %v191_v29 }
 0x1b3   :  { %v3411_v30 = vpop.eup %3410 }
 0x1b4   :  { %v194_v31 = vsel %vm94_vm0, %v3411_v30, 0.0  ;;  %v328_v0 = vpop.permute.xlu0 %327 }
 0x1b5   :  { %195 = vadd.xlane.f32.xlu1 %v194_v31 }
 0x1b8   :  { %v334_v6 = vpop.permute.xlu0 %333 }
 0x1bc   :  { %v340_v11 = vpop.permute.xlu0 %339 }
 0x1c6   :  { %305 = vrot.lane.b32.xlu1 %v3695_v14, %s3557_s14 }
 0x1ca   :  { %309 = vrot.lane.b32.xlu1 %v3693_v13, %s3562_s22 }
 0x1ce   :  { %311 = vrot.lane.b32.xlu1 %v3695_v14, %s3562_s22 }
 0x1d2   :  { %317 = vrot.lane.b32.xlu1 %v3695_v14, %s3559_s6 }
 0x1d6   :  { %323 = vrot.lane.b32.xlu1 %v3695_v14, %s3560_s2 }
 0x1da   :  { %329 = vrot.lane.b32.xlu1 %v3695_v14, %s3561_s13 }
 0x1de   :  { %335 = vrot.lane.b32.xlu1 %v3695_v14, %s3563_s23 }
 0x1e2   :  { %341 = vrot.lane.b32.xlu1 %v3695_v14, %s3564_s24 }
 0x23e   :  { %v193_v33 = vpop.xlane.xlu1 %192 }
 0x23f   :  { %3412 = vrcp.f32 %v193_v33 }
 0x242   :  { %v196_v34 = vpop.xlane.xlu1 %195 }
 0x243   :  { %3414 = vrcp.f32 %v196_v34 }
 0x246   :  { %v306_v50 = vpop.permute.xlu1 %305 }
 0x247   :  { %v346_v57 = vsel %vm94_vm0, %v3695_v14, %v306_v50 }
 0x249   :  { %v3413_v35 = vpop.eup %3412 }
 0x24a   :  { %v199_v36 = vmul.f32 %v3413_v35, %v193_v33  ;;  %v310_v51 = vpop.permute.xlu1 %309 }
 0x24b   :  { %v348_v61 = vsel %vm347_vm2, %v345_v59, %v310_v51  ;;  %v3797_v59 = vld [vmem:[#allocation6 + $0x38] sm:$0xff] }
 0x24c   :  { %v201_v37 = vsub.f32 2.0, %v199_v36  ;;  %v351_v1 = vsel %vm350_vm3, %v348_v61, %v316_v55  ;;  %v3781_v55 = vld [vmem:[#allocation6 + $0x18] sm:$0xff] }
 0x24d   :  { %v3415_v38 = vpop.eup %3414  ;;  %v354_v3 = vsel %vm353_vm4, %v351_v1, %v322_v58  ;;  %v3793_v58 = vld [vmem:[#allocation6 + $0x30] sm:$0xff] }
 0x24e   :  { %v200_v39 = vmul.f32 %v3415_v38, %v196_v34  ;;  %v203_v40 = vmul.f32 %v3413_v35, %v201_v37  ;;  %v312_v52 = vpop.permute.xlu1 %311  ;;  %v357_v7 = vsel %vm356_vm5, %v354_v3, %v328_v0 }
 0x24f   :  { %v349_v60 = vsel %vm347_vm2, %v346_v57, %v312_v52  ;;  %v360_v9 = vsel %vm359_vm6, %v357_v7, %v334_v6  ;;  %v3769_v52 = vld [vmem:[#allocation6] sm:$0xff]  ;;  %v3789_v57 = vld [vmem:[#allocation6 + $0x28] sm:$0xff] }
 0x250   :  { %v202_v41 = vsub.f32 2.0, %v200_v39  ;;  %v205_v42 = vmul.f32 %v3409_v28, %v203_v40  ;;  %v363_v14 = vsel %vm362_vm7, %v360_v9, %v340_v11  ;;  %v576_v7 = vmul.f32 1e-05, %v3769_v52 }
 0x252   :  { %397 = vrot.lane.b32.xlu0 %v205_v42, %s3565_s3  ;;  %3135 = vmatprep.mubr.msk.f32.mxu1 %vm94_vm0, %v205_v42  ;;  %v204_v43 = vmul.f32 %v3415_v38, %v202_v41  ;;  %v318_v54 = vpop.permute.xlu1 %317 }
 0x253   :  { %v352_v63 = vsel %vm350_vm3, %v349_v60, %v318_v54  ;;  %v3777_v54 = vld [vmem:[#allocation6 + $0x10] sm:$0xff] }
 0x254   :  { %v206_v44 = vmul.f32 %v3411_v30, %v204_v43 }
 0x256   :  { %399 = vrot.lane.b32.xlu1 %v206_v44, %s3565_s3  ;;  %3136 = vmatmul.mubr.msk.f32.vlgmr.msra.gmra.mrb[0].mxu1 %vm94_vm0, %v206_v44  ;;  %v324_v56 = vpop.permute.xlu1 %323 }
 0x257   :  { %3142 = vmatprep.mubr.msk.f32.mxu1 %vm3567_vm1, %v3568_v49  ;;  %3326 = vmatpush3.bf16.msra.mxu1 %v3325_v48  ;;  %v355_v2 = vsel %vm353_vm4, %v352_v63, %v324_v56  ;;  %v3785_v56 = vld [vmem:[#allocation6 + $0x20] sm:$0xff] }
 0x25a   :  { %v330_v62 = vpop.permute.xlu1 %329  ;;  %600 = vrot.lane.b32.xlu1 %v3769_v52, %s3557_s14 }
 0x25b   :  { %v358_v5 = vsel %vm356_vm5, %v355_v2, %v330_v62 }
 0x25e   :  { %v336_v4 = vpop.permute.xlu1 %335  ;;  %602 = vrot.lane.b32.xlu1 %v3773_v53, %s3557_s14 }
 0x25f   :  { %v361_v8 = vsel %vm359_vm6, %v358_v5, %v336_v4  ;;  %v3569_v4 = vmov 0  }
 0x260   :  { %3394 = vset.pattern.permute.xlu1 %v3569_v4 }
 0x262   :  { %v342_v10 = vpop.permute.xlu1 %341  ;;  %604 = vrot.lane.b32.xlu1 %v3777_v54, %s3557_s14 }
 0x263   :  { %v364_v12 = vsel %vm362_vm7, %v361_v8, %v342_v10 }
 0x266   :  { %606 = vrot.lane.b32.xlu1 %v3781_v55, %s3557_s14 }
 0x26a   :  { %608 = vrot.lane.b32.xlu1 %v3785_v56, %s3557_s14 }
 0x26e   :  { %610 = vrot.lane.b32.xlu1 %v3789_v57, %s3557_s14 }
 0x272   :  { %612 = vrot.lane.b32.xlu1 %v3793_v58, %s3557_s14 }
 0x276   :  { %614 = vrot.lane.b32.xlu1 %v3797_v59, %s3557_s14 }
 0x2c4   :  { %v398_v46 = vpop.permute.xlu0 %397 }
 0x2c8   :  { %v400_v50 = vpop.permute.xlu1 %399 }
 0x2cc   :  { %v601_v5 = vpop.permute.xlu1 %600 }
 0x2d0   :  { %v603_v6 = vpop.permute.xlu1 %602 }
 0x2d4   :  { %v605_v8 = vpop.permute.xlu1 %604 }
 0x329   :  { %v3137_v13 = vpop.f32.mrb[0].mxu1 }
 0x32a   :  { %v367_v15 = vsel %vm365_vm8, %v3137_v13, 0.0  ;;  %v380_v16 = vmul.f32 %v3137_v13, %v364_v12  ;;  %v292_v17 = vpop.f32.mrb[1].mxu1 }
 0x32b   :  { %v366_v18 = vsel %vm365_vm8, %v292_v17, 0.0  ;;  %v379_v19 = vmul.f32 %v363_v14, %v292_v17 }
 0x32c   :  { %v382_v20 = vsel %vm365_vm8, %v380_v16, 0.0  ;;  %v368_v21 = vadd.f32 %v367_v15, %v366_v18  ;;  %v607_v15 = vpop.permute.xlu1 %606  ;;  %v578_v18 = vmul.f32 1e-05, %v3777_v54 }
 0x32d   :  { %v381_v22 = vsel %vm365_vm8, %v379_v19, 0.0 }
 0x32e   :  { %v369_v23 = vrot.slane %v368_v21, 4  ;;  %v383_v24 = vadd.f32 %v382_v20, %v381_v22 }
 0x330   :  { %v370_v25 = vadd.f32 %v369_v23, %v368_v21  ;;  %v384_v28 = vrot.slane %v383_v24, 4 }
 0x332   :  { %v371_v26 = vrot.slane %v370_v25, 2  ;;  %v385_v31 = vadd.f32 %v384_v28, %v383_v24  ;;  %v579_v24 = vmul.f32 1e-05, %v3781_v55 }
 0x334   :  { %v372_v27 = vadd.f32 %v371_v26, %v370_v25  ;;  %v386_v32 = vrot.slane %v385_v31, 2  ;;  %v609_v25 = vpop.permute.xlu1 %608 }
 0x336   :  { %v373_v29 = vrot.slane %v372_v27, 1  ;;  %v387_v33 = vadd.f32 %v386_v32, %v385_v31  ;;  %v580_v31 = vmul.f32 1e-05, %v3785_v56 }
 0x338   :  { %v374_v30 = vadd.f32 %v373_v29, %v372_v27  ;;  %v388_v36 = vrot.slane %v387_v33, 1 }
 0x33a   :  { %3416 = vrcp.f32 %v374_v30  ;;  %v389_v39 = vadd.f32 %v388_v36, %v387_v33 }
 0x344   :  { %v3417_v34 = vpop.eup %3416 }
 0x345   :  { %v376_v35 = vmul.f32 %v3417_v34, %v374_v30 }
 0x347   :  { %v377_v37 = vsub.f32 2.0, %v376_v35  ;;  %v611_v35 = vpop.permute.xlu1 %610 }
 0x349   :  { %v378_v38 = vmul.f32 %v3417_v34, %v377_v37 }
 0x34b   :  { %v393_v40 = vmul.f32 %v378_v38, %v292_v17  ;;  %v390_v41 = vmul.f32 %v389_v39, %v378_v38  ;;  %v394_v42 = vmul.f32 %v3137_v13, %v378_v38  ;;  %v581_v38 = vmul.f32 1e-05, %v3789_v57 }
 0x34d   :  { %v3761_v43 = vsub.f32 %v363_v14, %v390_v41  ;;  %v3763_v44 = vsub.f32 %v364_v12, %v390_v41  ;;  %v577_v12 = vmul.f32 1e-05, %v3773_v53 }
 0x34f   :  { %v395_v45 = vmul.f32 %v393_v40, %v3761_v43  ;;  %v396_v48 = vmul.f32 %v394_v42, %v3763_v44 }
 0x351   :  { %v403_v47 = vsel %vm365_vm8, %v395_v45, %v398_v46  ;;  %v404_v51 = vsel %vm365_vm8, %v396_v48, %v400_v50  ;;  %v582_v46 = vmul.f32 1e-05, %v3793_v58 }
 0x352   :  { %407 = vxpose.xlu0.b32.start [1/2] (short) (narrow) %v403_v47, 72  ;;  %v613_v47 = vpop.permute.xlu1 %612 }
 0x356   :  { %408 = vxpose.xlu0.b32.end [2/2] (short) (narrow) %v404_v51, 72 }
 0x37f   :  { %3393 = vset.pattern.permute.xlu0 %v3569_v4 }
 0x3d2   :  { %v423_v60 = vpop.trf.xlu0 }
 0x3d3   :  { %3143 = vmatmul.mubr.msk.f32.vlgmr.msra.gmra.mrb[2].mxu1 %vm347_vm2, %v423_v60 }
 0x3d4   :  { %3145 = vmatprep.mubr.msk.f32.mxu1 %vm3567_vm1, %v3568_v49 }
 0x3d6   :  { %v424_v61 = vpop.trf.xlu0 }
 0x3d7   :  { %3146 = vmatmul.mubr.msk.f32.gmra.mrb[4].mxu1 %vm347_vm2, %v424_v61 }
 0x3d8   :  { %3148 = vmatprep.mubr.msk.f32.mxu1 %vm3567_vm1, %v3568_v49 }
 0x3da   :  { %v425_v62 = vpop.trf.xlu0 }
 0x3db   :  { %3149 = vmatmul.mubr.msk.f32.gmra.mrb[6].mxu1 %vm347_vm2, %v425_v62  ;;  %v583_v62 = vmul.f32 1e-05, %v3797_v59 }
 0x3dc   :  { %3151 = vmatprep.mubr.msk.f32.mxu1 %vm3567_vm1, %v3568_v49 }
 0x3de   :  { %v426_v63 = vpop.trf.xlu0 }
 0x3df   :  { %3152 = vmatmul.mubr.msk.f32.gmra.mrb[8].mxu1 %vm347_vm2, %v426_v63 }
 0x3e0   :  { %3154 = vmatprep.mubr.msk.f32.mxu1 %vm3567_vm1, %v3568_v49 }
 0x3e2   :  { %v427_v0 = vpop.trf.xlu0 }
 0x3e3   :  { %3155 = vmatmul.mubr.msk.f32.gmra.mrb[10].mxu1 %vm347_vm2, %v427_v0 }
 0x3e4   :  { %3157 = vmatprep.mubr.msk.f32.mxu1 %vm3567_vm1, %v3568_v49 }
 0x3e6   :  { %v428_v1 = vpop.trf.xlu0 }
 0x3e7   :  { %3158 = vmatmul.mubr.msk.f32.gmra.mrb[12].mxu1 %vm347_vm2, %v428_v1  ;;  %v615_v1 = vpop.permute.xlu1 %614 }
 0x3e8   :  { %3160 = vmatprep.mubr.msk.f32.mxu1 %vm3567_vm1, %v3568_v49 }
 0x3ea   :  { %v429_v2 = vpop.trf.xlu0 }
 0x3eb   :  { %3161 = vmatmul.mubr.msk.f32.gmra.mrb[14].mxu1 %vm347_vm2, %v429_v2 }
 0x3ec   :  { %3163 = vmatprep.mubr.msk.f32.mxu1 %vm3567_vm1, %v3568_v49 }
 0x3ee   :  { %v430_v3 = vpop.trf.xlu0 }
 0x3ef   :  { %3164 = vmatmul.mubr.msk.f32.gmra.mrb[16].mxu1 %vm347_vm2, %v430_v3 }
 0x3f0   :  { %3166 = vmatprep.mubr.msk.f32.mxu1 %vm3567_vm1, %v3568_v49 }
 0x4a6   :  { %v532_v9 = vpop.f32.mrb[2].mxu1 }
 0x4a7   :  { %v584_v10 = vadd.f32 %v576_v7, %v532_v9  ;;  %v3144_v11 = vpop.f32.mrb[3].mxu1  ;;  %v431_v7 = vpop.trf.xlu0 }
 0x4a8   :  { %3167 = vmatmul.mubr.msk.f32.gmra.mrb[18].mxu1 %vm347_vm2, %v431_v7 }
 0x4a9   :  { %v3828_v13 = vsel %vm94_vm0, %v584_v10, %v601_v5 }
 0x4aa   :  { %632 = vst.msk [vmem:[#allocation2] sm:$0xff] %vm347_vm2, %v3828_v13  ;;  %v537_v49 = vpop.f32.mrb[4].mxu1  ;;  %v651_v14 = vsub.f32 %v3828_v13, %v3769_v52 }
 0x4ab   :  { %v585_v16 = vadd.f32 %v577_v12, %v537_v49  ;;  %v3147_v17 = vpop.f32.mrb[5].mxu1  ;;  %v3893_v12 = vld [vmem:[#allocation3] sm:$0xff] }
 0x4ac   :  { %661 = vperm.xlu1 %3394, %v651_v14  }
 0x4ad   :  { %v3836_v19 = vsel %vm94_vm0, %v585_v16, %v603_v6 }
 0x4ae   :  { %633 = vst.msk [vmem:[#allocation2 + $0x8] sm:$0xff] %vm347_vm2, %v3836_v19  ;;  %v542_v20 = vpop.f32.mrb[6].mxu1  ;;  %v652_v21 = vsub.f32 %v3836_v19, %v3773_v53 }
 0x4af   :  { %v586_v22 = vadd.f32 %v578_v18, %v542_v20  ;;  %v3150_v23 = vpop.f32.mrb[7].mxu1  ;;  %v3897_v20 = vld [vmem:[#allocation3 + $0x8] sm:$0xff] }
 0x4b0   :  { %666 = vperm.xlu1 %3394, %v652_v21   ;;  %v3899_v23 = vld [vmem:[#allocation3 + $0x10] sm:$0xff] }
 0x4b1   :  { %v3844_v26 = vsel %vm94_vm0, %v586_v22, %v605_v8 }
 0x4b2   :  { %634 = vst.msk [vmem:[#allocation2 + $0x10] sm:$0xff] %vm347_vm2, %v3844_v26  ;;  %v547_v27 = vpop.f32.mrb[8].mxu1  ;;  %v653_v28 = vsub.f32 %v3844_v26, %v3777_v54 }
 0x4b3   :  { %v587_v29 = vadd.f32 %v579_v24, %v547_v27  ;;  %v3153_v30 = vpop.f32.mrb[9].mxu1 }
 0x4b4   :  { %671 = vperm.xlu1 %3394, %v653_v28   ;;  %v3904_v28 = vld [vmem:[#allocation3 + $0x18] sm:$0xff] }
 0x4b5   :  { %v3852_v32 = vsel %vm94_vm0, %v587_v29, %v607_v15  ;;  %v3906_v29 = vld [vmem:[#allocation3 + $0x20] sm:$0xff] }
 0x4b6   :  { %635 = vst.msk [vmem:[#allocation2 + $0x18] sm:$0xff] %vm347_vm2, %v3852_v32  ;;  %v552_v33 = vpop.f32.mrb[10].mxu1  ;;  %v654_v34 = vsub.f32 %v3852_v32, %v3781_v55 }
 0x4b7   :  { %v588_v36 = vadd.f32 %v580_v31, %v552_v33  ;;  %v3156_v37 = vpop.f32.mrb[11].mxu1 }
 0x4b8   :  { %676 = vperm.xlu1 %3394, %v654_v34   ;;  %v3912_v34 = vld [vmem:[#allocation3 + $0x28] sm:$0xff] }
 0x4b9   :  { %v3860_v39 = vsel %vm94_vm0, %v588_v36, %v609_v25 }
 0x4ba   :  { %636 = vst.msk [vmem:[#allocation2 + $0x20] sm:$0xff] %vm347_vm2, %v3860_v39  ;;  %v557_v40 = vpop.f32.mrb[12].mxu1  ;;  %v655_v41 = vsub.f32 %v3860_v39, %v3785_v56 }
 0x4bb   :  { %v589_v42 = vadd.f32 %v581_v38, %v557_v40  ;;  %v3159_v45 = vpop.f32.mrb[13].mxu1  ;;  %v3920_v38 = vld [vmem:[#allocation3 + $0x38] sm:$0xff] }
 0x4bc   :  { %681 = vperm.xlu1 %3394, %v655_v41  }
 0x4bd   :  { %v3868_v48 = vsel %vm94_vm0, %v589_v42, %v611_v35  ;;  %v640_v8 = vld [vmem:[#allocation2] ss:$8 sm:$0xf] }
 0x4be   :  { %637 = vst.msk [vmem:[#allocation2 + $0x28] sm:$0xff] %vm347_vm2, %v3868_v48  ;;  %v562_v50 = vpop.f32.mrb[14].mxu1  ;;  %v656_v51 = vsub.f32 %v3868_v48, %v3789_v57  ;;  %v3914_v35 = vld [vmem:[#allocation3 + $0x30] sm:$0xff] }
 0x4bf   :  { %v590_v60 = vadd.f32 %v582_v46, %v562_v50  ;;  %v3162_v61 = vpop.f32.mrb[15].mxu1  ;;  %v3570_v46 = vmov 1  }
 0x4c0   :  { %686 = vperm.xlu1 %3394, %v656_v51  }
 0x4c1   :  { %v3876_v63 = vsel %vm94_vm0, %v590_v60, %v613_v47 }
 0x4c2   :  { %638 = vst.msk [vmem:[#allocation2 + $0x30] sm:$0xff] %vm347_vm2, %v3876_v63  ;;  %v567_v0 = vpop.f32.mrb[16].mxu1  ;;  %v657_v2 = vsub.f32 %v3876_v63, %v3793_v58 }
 0x4c3   :  { %v591_v3 = vadd.f32 %v583_v62, %v567_v0  ;;  %v3165_v4 = vpop.f32.mrb[17].mxu1 }
 0x4c4   :  { %691 = vperm.xlu1 %3394, %v657_v2  }
 0x4c5   :  { %v3883_v5 = vsel %vm94_vm0, %v591_v3, %v615_v1 }
 0x4c6   :  { %639 = vst.msk [vmem:[#allocation2 + $0x38] sm:$0xff] %vm347_vm2, %v3883_v5  ;;  %v658_v6 = vsub.f32 %v3883_v5, %v3797_v59 }
 0x4c8   :  { %696 = vperm.xlu1 %3394, %v658_v6  }
 0x4cc   :  { %3395 = vset.pattern.permute.xlu1 %v3570_v46 }
 0x4cd   :  { %v641_v9 = vld [vmem:[#allocation2] ss:$8 sm:$0xf0] }
 0x4ce   :  { %v3890_v10 = vor.u32 %v641_v9, %v640_v8 }
 0x4d0   :  { %3418 = vrcp.f32 %v3890_v10 }
 0x4da   :  { %v3419_v11 = vpop.eup %3418 }
 0x4db   :  { %647 = vperm.xlu0 %3393, %v3419_v11  }
 0x52b   :  { %v662_v49 = vpop.permute.xlu1 %661 }
 0x52c   :  { %v699_v14 = vmul.f32 %v662_v49, %v3893_v12 }
 0x52e   :  { %3171 = vmatprep.mubr.msk.f32.mxu0 %vm94_vm0, %v699_v14 }
 0x52f   :  { %v667_v15 = vpop.permute.xlu1 %666 }
 0x530   :  { %v700_v25 = vmul.f32 %v667_v15, %v3897_v20 }
 0x533   :  { %v672_v16 = vpop.permute.xlu1 %671 }
 0x534   :  { %v701_v27 = vmul.f32 %v672_v16, %v3899_v23 }
 0x537   :  { %v677_v17 = vpop.permute.xlu1 %676 }
 0x538   :  { %v702_v31 = vmul.f32 %v677_v17, %v3904_v28 }
 0x53b   :  { %v682_v18 = vpop.permute.xlu1 %681 }
 0x53c   :  { %v703_v33 = vmul.f32 %v682_v18, %v3906_v29 }
 0x53f   :  { %v687_v21 = vpop.permute.xlu1 %686 }
 0x540   :  { %v704_v36 = vmul.f32 %v687_v21, %v3912_v34 }
 0x543   :  { %v692_v30 = vpop.permute.xlu1 %691 }
 0x544   :  { %v705_v37 = vmul.f32 %v692_v30, %v3914_v35 }
 0x547   :  { %v697_v40 = vpop.permute.xlu1 %696 }
 0x548   :  { %v706_v41 = vmul.f32 %v697_v40, %v3920_v38 }
 0x55a   :  { %v648_v22 = vpop.permute.xlu0 %647 }
 0x55b   :  { %v650_v24 = vmul.f32 %v648_v22, %v3890_v10 }
 0x55d   :  { %3169 = vmatprep.subr.mxu0 %v650_v24 }
 0x55e   :  { %3170 = vmatpush3.msra.mxu0 %v650_v24 }
 0x55f   :  { %3172 = vmatmul.mubr.msk.f32.vlgmr.msra.gmra.mrb[2].mxu0 %vm94_vm0, %v700_v25 }
 0x560   :  { %3174 = vmatprep.mubr.msk.f32.mxu0 %vm94_vm0, %v701_v27 }
 0x563   :  { %3175 = vmatmul.mubr.msk.f32.gmra.mrb[4].mxu0 %vm94_vm0, %v702_v31 }
 0x564   :  { %3177 = vmatprep.mubr.msk.f32.mxu0 %vm94_vm0, %v703_v33 }
 0x567   :  { %3178 = vmatmul.mubr.msk.f32.gmra.mrb[6].mxu0 %vm94_vm0, %v704_v36 }
 0x568   :  { %3180 = vmatprep.mubr.msk.f32.mxu0 %vm94_vm0, %v705_v37 }
 0x56b   :  { %3181 = vmatmul.mubr.msk.f32.gmra.mrb[8].mxu0 %vm94_vm0, %v706_v41 }
 0x57b   :  { %v3926_v42 = vpop.f32.mrb[18].mxu1 }
 0x57c   :  { %v3168_v45 = vpop.f32.mrb[19].mxu1 }
 0x632   :  { %v3173_v47 = vpop.f32.mrb[2].mxu0 }
 0x633   :  { %v3929_v50 = vsub.f32 %v3836_v19, %v3173_v47  ;;  %v797_v51 = vpop.f32.mrb[3].mxu0 }
 0x634   :  { %v3932_v60 = vsub.f32 %v3828_v13, %v797_v51 }
 0x635   :  { %845 = vst.msk [vmem:[#allocation2 + $0x8] sm:$0xff] %vm347_vm2, %v3929_v50  ;;  %v870_v61 = vsub.f32 %v3929_v50, %v3773_v53 }
 0x636   :  { %844 = vst.msk [vmem:[#allocation2] sm:$0xff] %vm347_vm2, %v3932_v60  ;;  %v3176_v62 = vpop.f32.mrb[4].mxu0  ;;  %v869_v13 = vsub.f32 %v3932_v60, %v3769_v52 }
 0x637   :  { %v3941_v0 = vsub.f32 %v3852_v32, %v3176_v62  ;;  %884 = vperm.xlu1 %3395, %v870_v61   ;;  %v807_v19 = vpop.f32.mrb[5].mxu0  ;;  %v3571_v61 = vmov 2  }
 0x638   :  { %v3944_v1 = vsub.f32 %v3844_v26, %v807_v19  ;;  %3396 = vset.pattern.permute.xlu0 %v3571_v61 }
 0x639   :  { %847 = vst.msk [vmem:[#allocation2 + $0x18] sm:$0xff] %vm347_vm2, %v3941_v0  ;;  %v872_v26 = vsub.f32 %v3941_v0, %v3781_v55 }
 0x63a   :  { %846 = vst.msk [vmem:[#allocation2 + $0x10] sm:$0xff] %vm347_vm2, %v3944_v1  ;;  %v3179_v2 = vpop.f32.mrb[6].mxu0 }
 0x63b   :  { %v3953_v3 = vsub.f32 %v3868_v48, %v3179_v2  ;;  %879 = vperm.xlu1 %3395, %v869_v13   ;;  %v817_v32 = vpop.f32.mrb[7].mxu0 }
 0x63c   :  { %v3956_v4 = vsub.f32 %v3860_v39, %v817_v32  ;;  %v871_v39 = vsub.f32 %v3944_v1, %v3777_v54 }
 0x63d   :  { %849 = vst.msk [vmem:[#allocation2 + $0x28] sm:$0xff] %vm347_vm2, %v3953_v3  ;;  %v874_v14 = vsub.f32 %v3953_v3, %v3789_v57 }
 0x63e   :  { %848 = vst.msk [vmem:[#allocation2 + $0x20] sm:$0xff] %vm347_vm2, %v3956_v4  ;;  %v3182_v6 = vpop.f32.mrb[8].mxu0 }
 0x63f   :  { %v3965_v7 = vsub.f32 %v3883_v5, %v3182_v6  ;;  %894 = vperm.xlu1 %3395, %v872_v26   ;;  %v827_v48 = vpop.f32.mrb[9].mxu0 }
 0x640   :  { %v3968_v8 = vsub.f32 %v3876_v63, %v827_v48  ;;  %v873_v63 = vsub.f32 %v3956_v4, %v3785_v56 }
 0x641   :  { %851 = vst.msk [vmem:[#allocation2 + $0x38] sm:$0xff] %vm347_vm2, %v3965_v7  ;;  %v853_v9 = vld [vmem:[#allocation2 + $0x1] ss:$8 sm:$0xf]  ;;  %v876_v16 = vsub.f32 %v3965_v7, %v3797_v59 }
 0x642   :  { %850 = vst.msk [vmem:[#allocation2 + $0x30] sm:$0xff] %vm347_vm2, %v3968_v8  ;;  %v875_v15 = vsub.f32 %v3968_v8, %v3793_v58 }
 0x643   :  { %889 = vperm.xlu1 %3395, %v871_v39  }
 0x649   :  { %v854_v11 = vld [vmem:[#allocation2 + $0x1] ss:$8 sm:$0xf0] }
 0x64a   :  { %v3976_v49 = vor.u32 %v854_v11, %v853_v9 }
 0x64c   :  { %3420 = vrcp.f32 %v3976_v49 }
 0x656   :  { %v3421_v5 = vpop.eup %3420 }
 0x657   :  { %865 = vperm.xlu1 %3395, %v3421_v5  }
 0x65b   :  { %899 = vperm.xlu1 %3395, %v873_v63  }
 0x65f   :  { %904 = vperm.xlu1 %3395, %v874_v14  }
 0x663   :  { %909 = vperm.xlu1 %3395, %v875_v15  }
 0x667   :  { %914 = vperm.xlu1 %3395, %v876_v16  }
 0x66b   :  { %3397 = vset.pattern.permute.xlu1 %v3571_v61 }
 0x6b6   :  { %v885_v17 = vpop.permute.xlu1 %884 }
 0x6b7   :  { %v918_v30 = vmul.f32 %v885_v17, %v3897_v20 }
 0x6ba   :  { %v880_v18 = vpop.permute.xlu1 %879 }
 0x6bb   :  { %v917_v21 = vmul.f32 %v880_v18, %v3893_v12 }
 0x6bd   :  { %3185 = vmatprep.mubr.msk.f32.mxu0 %vm94_vm0, %v917_v21 }
 0x6be   :  { %v895_v22 = vpop.permute.xlu1 %894 }
 0x6bf   :  { %v920_v36 = vmul.f32 %v895_v22, %v3904_v28 }
 0x6c2   :  { %v890_v24 = vpop.permute.xlu1 %889 }
 0x6c3   :  { %v919_v31 = vmul.f32 %v890_v24, %v3899_v23 }
 0x6d6   :  { %v866_v25 = vpop.permute.xlu1 %865 }
 0x6d7   :  { %v868_v27 = vmul.f32 %v866_v25, %v3976_v49 }
 0x6d9   :  { %3183 = vmatprep.subr.mxu0 %v868_v27 }
 0x6da   :  { %3184 = vmatpush3.msra.mxu0 %v868_v27  ;;  %v900_v33 = vpop.permute.xlu1 %899 }
 0x6db   :  { %3186 = vmatmul.mubr.msk.f32.vlgmr.msra.gmra.mrb[10].mxu0 %vm94_vm0, %v918_v30  ;;  %v921_v37 = vmul.f32 %v900_v33, %v3906_v29 }
 0x6dc   :  { %3188 = vmatprep.mubr.msk.f32.mxu0 %vm94_vm0, %v919_v31 }
 0x6de   :  { %v905_v40 = vpop.permute.xlu1 %904 }
 0x6df   :  { %3189 = vmatmul.mubr.msk.f32.gmra.mrb[12].mxu0 %vm94_vm0, %v920_v36  ;;  %v922_v41 = vmul.f32 %v905_v40, %v3912_v34 }
 0x6e0   :  { %3191 = vmatprep.mubr.msk.f32.mxu0 %vm94_vm0, %v921_v37 }
 0x6e2   :  { %v910_v45 = vpop.permute.xlu1 %909 }
 0x6e3   :  { %v923_v46 = vmul.f32 %v910_v45, %v3914_v35  ;;  %3192 = vmatmul.mubr.msk.f32.gmra.mrb[14].mxu0 %vm94_vm0, %v922_v41 }
 0x6e5   :  { %3194 = vmatprep.mubr.msk.f32.mxu0 %vm94_vm0, %v923_v46 }
 0x6e6   :  { %v915_v47 = vpop.permute.xlu1 %914 }
 0x6e7   :  { %v924_v51 = vmul.f32 %v915_v47, %v3920_v38 }
 0x6e9   :  { %3195 = vmatmul.mubr.msk.f32.gmra.mrb[16].mxu0 %vm94_vm0, %v924_v51 }
 0x7ae   :  { %v3187_v62 = vpop.f32.mrb[10].mxu0 }
 0x7af   :  { %v4005_v19 = vsub.f32 %v3929_v50, %v3187_v62  ;;  %v1015_v13 = vpop.f32.mrb[11].mxu0 }
 0x7b0   :  { %v4008_v2 = vsub.f32 %v3932_v60, %v1015_v13 }
 0x7b1   :  { %1063 = vst.msk [vmem:[#allocation2 + $0x8] sm:$0xff] %vm347_vm2, %v4005_v19  ;;  %v1088_v39 = vsub.f32 %v4005_v19, %v3773_v53 }
 0x7b2   :  { %1062 = vst.msk [vmem:[#allocation2] sm:$0xff] %vm347_vm2, %v4008_v2  ;;  %v3190_v32 = vpop.f32.mrb[12].mxu0  ;;  %v1087_v26 = vsub.f32 %v4008_v2, %v3769_v52 }
 0x7b3   :  { %v4017_v6 = vsub.f32 %v3941_v0, %v3190_v32  ;;  %v1025_v48 = vpop.f32.mrb[13].mxu0 }
 0x7b4   :  { %v4020_v50 = vsub.f32 %v3944_v1, %v1025_v48  ;;  %1097 = vperm.xlu1 %3397, %v1087_v26   ;;  %v3572_v26 = vmov 3  }
 0x7b5   :  { %1065 = vst.msk [vmem:[#allocation2 + $0x18] sm:$0xff] %vm347_vm2, %v4017_v6  ;;  %v1090_v1 = vsub.f32 %v4017_v6, %v3781_v55 }
 0x7b6   :  { %1064 = vst.msk [vmem:[#allocation2 + $0x10] sm:$0xff] %vm347_vm2, %v4020_v50  ;;  %v3193_v60 = vpop.f32.mrb[14].mxu0  ;;  %v1089_v18 = vsub.f32 %v4020_v50, %v3777_v54 }
 0x7b7   :  { %v4029_v9 = vsub.f32 %v3953_v3, %v3193_v60  ;;  %v1035_v0 = vpop.f32.mrb[15].mxu0 }
 0x7b8   :  { %v4032_v11 = vsub.f32 %v3956_v4, %v1035_v0  ;;  %1102 = vperm.xlu1 %3397, %v1088_v39  }
 0x7b9   :  { %1067 = vst.msk [vmem:[#allocation2 + $0x28] sm:$0xff] %vm347_vm2, %v4029_v9  ;;  %v1092_v4 = vsub.f32 %v4029_v9, %v3789_v57 }
 0x7ba   :  { %1066 = vst.msk [vmem:[#allocation2 + $0x20] sm:$0xff] %vm347_vm2, %v4032_v11  ;;  %v1091_v21 = vsub.f32 %v4032_v11, %v3785_v56 }
 0x7bc   :  { %1112 = vperm.xlu1 %3397, %v1090_v1   ;;  %v3196_v5 = vpop.f32.mrb[16].mxu0 }
 0x7bd   :  { %v4041_v63 = vsub.f32 %v3965_v7, %v3196_v5  ;;  %v1045_v3 = vpop.f32.mrb[17].mxu0  ;;  %v1071_v7 = vld [vmem:[#allocation2 + $0x2] ss:$8 sm:$0xf] }
 0x7be   :  { %v4044_v14 = vsub.f32 %v3968_v8, %v1045_v3 }
 0x7bf   :  { %1069 = vst.msk [vmem:[#allocation2 + $0x38] sm:$0xff] %vm347_vm2, %v4041_v63  ;;  %v1094_v15 = vsub.f32 %v4041_v63, %v3797_v59 }
 0x7c0   :  { %1068 = vst.msk [vmem:[#allocation2 + $0x30] sm:$0xff] %vm347_vm2, %v4044_v14  ;;  %1122 = vperm.xlu1 %3397, %v1092_v4   ;;  %v1093_v22 = vsub.f32 %v4044_v14, %v3793_v58 }
 0x7c4   :  { %1132 = vperm.xlu1 %3397, %v1094_v15  }
 0x7c7   :  { %v1072_v16 = vld [vmem:[#allocation2 + $0x2] ss:$8 sm:$0xf0] }
 0x7c8   :  { %v4054_v17 = vor.u32 %v1072_v16, %v1071_v7  ;;  %3399 = vset.pattern.permute.xlu1 %v3572_v26 }
 0x7ca   :  { %3422 = vrcp.f32 %v4054_v17 }
 0x7d4   :  { %v3423_v8 = vpop.eup %3422 }
 0x7d5   :  { %1083 = vperm.xlu0 %3396, %v3423_v8  }
 0x7d9   :  { %1107 = vperm.xlu0 %3396, %v1089_v18  }
 0x7dd   :  { %1117 = vperm.xlu0 %3396, %v1091_v21  }
 0x7e1   :  { %1127 = vperm.xlu0 %3396, %v1093_v22  }
 0x7e5   :  { %3398 = vset.pattern.permute.xlu0 %v3572_v26 }
 0x833   :  { %v1098_v24 = vpop.permute.xlu1 %1097 }
 0x834   :  { %v1135_v25 = vmul.f32 %v1098_v24, %v3893_v12 }
 0x836   :  { %3199 = vmatprep.mubr.msk.f32.mxu0 %vm94_vm0, %v1135_v25 }
 0x837   :  { %v1103_v27 = vpop.permute.xlu1 %1102 }
 0x838   :  { %v1136_v36 = vmul.f32 %v1103_v27, %v3897_v20 }
 0x83b   :  { %v1113_v30 = vpop.permute.xlu1 %1112 }
 0x83c   :  { %v1138_v45 = vmul.f32 %v1113_v30, %v3904_v28 }
 0x83f   :  { %v1123_v41 = vpop.permute.xlu1 %1122 }
 0x840   :  { %v1140_v51 = vmul.f32 %v1123_v41, %v3912_v34 }
 0x843   :  { %v1133_v61 = vpop.permute.xlu1 %1132 }
 0x844   :  { %v1142_v32 = vmul.f32 %v1133_v61, %v3920_v38 }
 0x854   :  { %v1084_v31 = vpop.permute.xlu0 %1083 }
 0x855   :  { %v1086_v33 = vmul.f32 %v1084_v31, %v4054_v17 }
 0x857   :  { %3197 = vmatprep.subr.mxu0 %v1086_v33 }
 0x858   :  { %3198 = vmatpush3.msra.mxu0 %v1086_v33  ;;  %v1108_v37 = vpop.permute.xlu0 %1107 }
 0x859   :  { %v1137_v40 = vmul.f32 %v1108_v37, %v3899_v23  ;;  %3200 = vmatmul.mubr.msk.f32.vlgmr.msra.gmra.mrb[18].mxu0 %vm94_vm0, %v1136_v36 }
 0x85b   :  { %3202 = vmatprep.mubr.msk.f32.mxu0 %vm94_vm0, %v1137_v40 }
 0x85c   :  { %v1118_v46 = vpop.permute.xlu0 %1117 }
 0x85d   :  { %v1139_v47 = vmul.f32 %v1118_v46, %v3906_v29  ;;  %3203 = vmatmul.mubr.msk.f32.gmra.mrb[20].mxu0 %vm94_vm0, %v1138_v45 }
 0x85f   :  { %3205 = vmatprep.mubr.msk.f32.mxu0 %vm94_vm0, %v1139_v47 }
 0x860   :  { %v1128_v62 = vpop.permute.xlu0 %1127 }
 0x861   :  { %v1141_v13 = vmul.f32 %v1128_v62, %v3914_v35  ;;  %3206 = vmatmul.mubr.msk.f32.gmra.mrb[22].mxu0 %vm94_vm0, %v1140_v51 }
 0x863   :  { %3208 = vmatprep.mubr.msk.f32.mxu0 %vm94_vm0, %v1141_v13 }
 0x865   :  { %3209 = vmatmul.mubr.msk.f32.gmra.mrb[24].mxu0 %vm94_vm0, %v1142_v32 }
 0x92c   :  { %v3201_v48 = vpop.f32.mrb[18].mxu0 }
 0x92d   :  { %v4081_v60 = vsub.f32 %v4005_v19, %v3201_v48  ;;  %v1233_v39 = vpop.f32.mrb[19].mxu0 }
 0x92e   :  { %v4084_v0 = vsub.f32 %v4008_v2, %v1233_v39 }
 0x92f   :  { %1281 = vst.msk [vmem:[#allocation2 + $0x8] sm:$0xff] %vm347_vm2, %v4081_v60  ;;  %v1306_v15 = vsub.f32 %v4081_v60, %v3773_v53 }
 0x930   :  { %1280 = vst.msk [vmem:[#allocation2] sm:$0xff] %vm347_vm2, %v4084_v0  ;;  %v3204_v1 = vpop.f32.mrb[20].mxu0  ;;  %v1305_v5 = vsub.f32 %v4084_v0, %v3769_v52 }
 0x931   :  { %v4093_v3 = vsub.f32 %v4017_v6, %v3204_v1  ;;  %v1243_v4 = vpop.f32.mrb[21].mxu0 }
 0x932   :  { %v4096_v19 = vsub.f32 %v4020_v50, %v1243_v4  ;;  %1315 = vperm.xlu1 %3399, %v1305_v5   ;;  %v3573_v4 = vmov 4  }
 0x933   :  { %1283 = vst.msk [vmem:[#allocation2 + $0x18] sm:$0xff] %vm347_vm2, %v4093_v3  ;;  %v1308_v8 = vsub.f32 %v4093_v3, %v3781_v55 }
 0x934   :  { %1282 = vst.msk [vmem:[#allocation2 + $0x10] sm:$0xff] %vm347_vm2, %v4096_v19  ;;  %v3207_v2 = vpop.f32.mrb[22].mxu0  ;;  %v1307_v27 = vsub.f32 %v4096_v19, %v3777_v54 }
 0x935   :  { %v4105_v7 = vsub.f32 %v4029_v9, %v3207_v2  ;;  %v1253_v6 = vpop.f32.mrb[23].mxu0 }
 0x936   :  { %v4108_v16 = vsub.f32 %v4032_v11, %v1253_v6  ;;  %1320 = vperm.xlu1 %3399, %v1306_v15  }
 0x937   :  { %1285 = vst.msk [vmem:[#allocation2 + $0x28] sm:$0xff] %vm347_vm2, %v4105_v7  ;;  %v1310_v11 = vsub.f32 %v4105_v7, %v3789_v57 }
 0x938   :  { %1284 = vst.msk [vmem:[#allocation2 + $0x20] sm:$0xff] %vm347_vm2, %v4108_v16  ;;  %v3210_v50 = vpop.f32.mrb[24].mxu0  ;;  %v1309_v30 = vsub.f32 %v4108_v16, %v3785_v56 }
 0x939   :  { %v4117_v18 = vsub.f32 %v4041_v63, %v3210_v50  ;;  %v1263_v9 = vpop.f32.mrb[25].mxu0 }
 0x93a   :  { %v4120_v21 = vsub.f32 %v4044_v14, %v1263_v9  ;;  %1330 = vperm.xlu1 %3399, %v1308_v8  }
 0x93b   :  { %1287 = vst.msk [vmem:[#allocation2 + $0x38] sm:$0xff] %vm347_vm2, %v4117_v18  ;;  %v1312_v22 = vsub.f32 %v4117_v18, %v3797_v59  ;;  %v1289_v63 = vld [vmem:[#allocation2 + $0x3] ss:$8 sm:$0xf] }
 0x93c   :  { %1286 = vst.msk [vmem:[#allocation2 + $0x30] sm:$0xff] %vm347_vm2, %v4120_v21  ;;  %v1311_v31 = vsub.f32 %v4120_v21, %v3793_v58 }
 0x93e   :  { %1340 = vperm.xlu1 %3399, %v1310_v11  }
 0x942   :  { %1350 = vperm.xlu1 %3399, %v1312_v22  }
 0x943   :  { %v1290_v24 = vld [vmem:[#allocation2 + $0x3] ss:$8 sm:$0xf0] }
 0x944   :  { %v4130_v25 = vor.u32 %v1290_v24, %v1289_v63 }
 0x946   :  { %3424 = vrcp.f32 %v4130_v25  ;;  %3401 = vset.pattern.permute.xlu1 %v3573_v4 }
 0x950   :  { %v3425_v14 = vpop.eup %3424 }
 0x951   :  { %1301 = vperm.xlu0 %3398, %v3425_v14  }
 0x955   :  { %1325 = vperm.xlu0 %3398, %v1307_v27  }
 0x959   :  { %1335 = vperm.xlu0 %3398, %v1309_v30  }
 0x95d   :  { %1345 = vperm.xlu0 %3398, %v1311_v31  }
 0x961   :  { %3400 = vset.pattern.permute.xlu0 %v3573_v4 }
 0x9b1   :  { %v1316_v33 = vpop.permute.xlu1 %1315 }
 0x9b2   :  { %v1353_v36 = vmul.f32 %v1316_v33, %v3893_v12 }
 0x9b4   :  { %3213 = vmatprep.mubr.msk.f32.mxu1 %vm94_vm0, %v1353_v36 }
 0x9b5   :  { %v1321_v37 = vpop.permute.xlu1 %1320 }
 0x9b6   :  { %v1354_v46 = vmul.f32 %v1321_v37, %v3897_v20 }
 0x9b9   :  { %v1331_v40 = vpop.permute.xlu1 %1330 }
 0x9ba   :  { %v1356_v62 = vmul.f32 %v1331_v40, %v3904_v28 }
 0x9bd   :  { %v1341_v61 = vpop.permute.xlu1 %1340 }
 0x9be   :  { %v1358_v26 = vmul.f32 %v1341_v61, %v3912_v34 }
 0x9c1   :  { %v1351_v48 = vpop.permute.xlu1 %1350 }
 0x9c2   :  { %v1360_v5 = vmul.f32 %v1351_v48, %v3920_v38 }
 0x9d0   :  { %v1302_v41 = vpop.permute.xlu0 %1301 }
 0x9d1   :  { %v1304_v45 = vmul.f32 %v1302_v41, %v4130_v25 }
 0x9d3   :  { %3211 = vmatprep.subr.mxu1 %v1304_v45 }
 0x9d4   :  { %3212 = vmatpush3.msra.mxu1 %v1304_v45  ;;  %v1326_v47 = vpop.permute.xlu0 %1325 }
 0x9d5   :  { %v1355_v51 = vmul.f32 %v1326_v47, %v3899_v23  ;;  %3214 = vmatmul.mubr.msk.f32.vlgmr.msra.gmra.mrb[20].mxu1 %vm94_vm0, %v1354_v46 }
 0x9d7   :  { %3216 = vmatprep.mubr.msk.f32.mxu1 %vm94_vm0, %v1355_v51 }
 0x9d8   :  { %v1336_v13 = vpop.permute.xlu0 %1335 }
 0x9d9   :  { %v1357_v32 = vmul.f32 %v1336_v13, %v3906_v29  ;;  %3217 = vmatmul.mubr.msk.f32.gmra.mrb[22].mxu1 %vm94_vm0, %v1356_v62 }
 0x9db   :  { %3219 = vmatprep.mubr.msk.f32.mxu1 %vm94_vm0, %v1357_v32 }
 0x9dc   :  { %v1346_v39 = vpop.permute.xlu0 %1345 }
 0x9dd   :  { %v1359_v1 = vmul.f32 %v1346_v39, %v3914_v35  ;;  %3220 = vmatmul.mubr.msk.f32.gmra.mrb[24].mxu1 %vm94_vm0, %v1358_v26 }
 0x9df   :  { %3222 = vmatprep.mubr.msk.f32.mxu1 %vm94_vm0, %v1359_v1 }
 0x9e1   :  { %3223 = vmatmul.mubr.msk.f32.gmra.mrb[26].mxu1 %vm94_vm0, %v1360_v5 }
 0xaa8   :  { %v3215_v2 = vpop.f32.mrb[20].mxu1 }
 0xaa9   :  { %v4157_v15 = vsub.f32 %v4081_v60, %v3215_v2  ;;  %v1451_v6 = vpop.f32.mrb[21].mxu1 }
 0xaaa   :  { %v4160_v50 = vsub.f32 %v4084_v0, %v1451_v6 }
 0xaab   :  { %1499 = vst.msk [vmem:[#allocation2 + $0x8] sm:$0xff] %vm347_vm2, %v4157_v15  ;;  %v1524_v63 = vsub.f32 %v4157_v15, %v3773_v53 }
 0xaac   :  { %1498 = vst.msk [vmem:[#allocation2] sm:$0xff] %vm347_vm2, %v4160_v50  ;;  %v3218_v8 = vpop.f32.mrb[22].mxu1  ;;  %v1523_v9 = vsub.f32 %v4160_v50, %v3769_v52 }
 0xaad   :  { %v4169_v11 = vsub.f32 %v4093_v3, %v3218_v8  ;;  %v1461_v22 = vpop.f32.mrb[23].mxu1 }
 0xaae   :  { %v4172_v60 = vsub.f32 %v4096_v19, %v1461_v22  ;;  %1533 = vperm.xlu1 %3401, %v1523_v9  }
 0xaaf   :  { %1501 = vst.msk [vmem:[#allocation2 + $0x18] sm:$0xff] %vm347_vm2, %v4169_v11  ;;  %v1526_v27 = vsub.f32 %v4169_v11, %v3781_v55 }
 0xab0   :  { %1500 = vst.msk [vmem:[#allocation2 + $0x10] sm:$0xff] %vm347_vm2, %v4172_v60  ;;  %v3221_v0 = vpop.f32.mrb[24].mxu1  ;;  %v1525_v40 = vsub.f32 %v4172_v60, %v3777_v54 }
 0xab1   :  { %v4181_v24 = vsub.f32 %v4105_v7, %v3221_v0  ;;  %v1471_v3 = vpop.f32.mrb[25].mxu1  ;;  %v3574_v0 = vmov 5  }
 0xab2   :  { %v4184_v14 = vsub.f32 %v4108_v16, %v1471_v3  ;;  %1538 = vperm.xlu1 %3401, %v1524_v63  }
 0xab3   :  { %1503 = vst.msk [vmem:[#allocation2 + $0x28] sm:$0xff] %vm347_vm2, %v4181_v24  ;;  %v1528_v16 = vsub.f32 %v4181_v24, %v3789_v57 }
 0xab4   :  { %1502 = vst.msk [vmem:[#allocation2 + $0x20] sm:$0xff] %vm347_vm2, %v4184_v14  ;;  %v3224_v19 = vpop.f32.mrb[26].mxu1  ;;  %v1527_v41 = vsub.f32 %v4184_v14, %v3785_v56 }
 0xab5   :  { %v4193_v30 = vsub.f32 %v4117_v18, %v3224_v19  ;;  %v1481_v7 = vpop.f32.mrb[27].mxu1 }
 0xab6   :  { %v4196_v31 = vsub.f32 %v4120_v21, %v1481_v7  ;;  %1548 = vperm.xlu1 %3401, %v1526_v27  }
 0xab7   :  { %1505 = vst.msk [vmem:[#allocation2 + $0x38] sm:$0xff] %vm347_vm2, %v4193_v30  ;;  %v1530_v33 = vsub.f32 %v4193_v30, %v3797_v59  ;;  %v1507_v18 = vld [vmem:[#allocation2 + $0x4] ss:$8 sm:$0xf] }
 0xab8   :  { %1504 = vst.msk [vmem:[#allocation2 + $0x30] sm:$0xff] %vm347_vm2, %v4196_v31  ;;  %v1529_v45 = vsub.f32 %v4196_v31, %v3793_v58 }
 0xaba   :  { %1558 = vperm.xlu1 %3401, %v1528_v16  }
 0xabe   :  { %1568 = vperm.xlu1 %3401, %v1530_v33  }
 0xabf   :  { %v1508_v36 = vld [vmem:[#allocation2 + $0x4] ss:$8 sm:$0xf0] }
 0xac0   :  { %v4206_v37 = vor.u32 %v1508_v36, %v1507_v18 }
 0xac2   :  { %3426 = vrcp.f32 %v4206_v37  ;;  %3403 = vset.pattern.permute.xlu1 %v3574_v0 }
 0xacc   :  { %v3427_v21 = vpop.eup %3426 }
 0xacd   :  { %1519 = vperm.xlu0 %3400, %v3427_v21  }
 0xad1   :  { %1543 = vperm.xlu0 %3400, %v1525_v40  }
 0xad5   :  { %1553 = vperm.xlu0 %3400, %v1527_v41  }
 0xad9   :  { %1563 = vperm.xlu0 %3400, %v1529_v45  }
 0xadd   :  { %3402 = vset.pattern.permute.xlu0 %v3574_v0 }
 0xb2d   :  { %v1534_v46 = vpop.permute.xlu1 %1533 }
 0xb2e   :  { %v1571_v47 = vmul.f32 %v1534_v46, %v3893_v12 }
 0xb30   :  { %3227 = vmatprep.mubr.msk.f32.mxu0 %vm94_vm0, %v1571_v47 }
 0xb31   :  { %v1539_v51 = vpop.permute.xlu1 %1538 }
 0xb32   :  { %v1572_v32 = vmul.f32 %v1539_v51, %v3897_v20 }
 0xb35   :  { %v1549_v61 = vpop.permute.xlu1 %1548 }
 0xb36   :  { %v1574_v1 = vmul.f32 %v1549_v61, %v3904_v28 }
 0xb39   :  { %v1559_v39 = vpop.permute.xlu1 %1558 }
 0xb3a   :  { %v1576_v2 = vmul.f32 %v1559_v39, %v3912_v34 }
 0xb3d   :  { %v1569_v6 = vpop.permute.xlu1 %1568 }
 0xb3e   :  { %v1578_v22 = vmul.f32 %v1569_v6, %v3920_v38 }
 0xb4c   :  { %v1520_v62 = vpop.permute.xlu0 %1519 }
 0xb4d   :  { %v1522_v13 = vmul.f32 %v1520_v62, %v4206_v37 }
 0xb4f   :  { %3225 = vmatprep.subr.mxu0 %v1522_v13 }
 0xb50   :  { %3226 = vmatpush3.msra.mxu0 %v1522_v13  ;;  %v1544_v26 = vpop.permute.xlu0 %1543 }
 0xb51   :  { %v1573_v48 = vmul.f32 %v1544_v26, %v3899_v23  ;;  %3228 = vmatmul.mubr.msk.f32.vlgmr.msra.gmra.mrb[26].mxu0 %vm94_vm0, %v1572_v32 }
 0xb53   :  { %3230 = vmatprep.mubr.msk.f32.mxu0 %vm94_vm0, %v1573_v48 }
 0xb54   :  { %v1554_v5 = vpop.permute.xlu0 %1553 }
 0xb55   :  { %v1575_v4 = vmul.f32 %v1554_v5, %v3906_v29  ;;  %3231 = vmatmul.mubr.msk.f32.gmra.mrb[28].mxu0 %vm94_vm0, %v1574_v1 }
 0xb57   :  { %3233 = vmatprep.mubr.msk.f32.mxu0 %vm94_vm0, %v1575_v4 }
 0xb58   :  { %v1564_v8 = vpop.permute.xlu0 %1563 }
 0xb59   :  { %v1577_v9 = vmul.f32 %v1564_v8, %v3914_v35  ;;  %3234 = vmatmul.mubr.msk.f32.gmra.mrb[30].mxu0 %vm94_vm0, %v1576_v2 }
 0xb5b   :  { %3236 = vmatprep.mubr.msk.f32.mxu0 %vm94_vm0, %v1577_v9 }
 0xb5d   :  { %3237 = vmatmul.mubr.msk.f32.gmra.mrb[32].mxu0 %vm94_vm0, %v1578_v22  ;;  %v3575_v22 = vmov 6  }
 0xc24   :  { %v3229_v63 = vpop.f32.mrb[26].mxu0 }
 0xc25   :  { %v4233_v3 = vsub.f32 %v4157_v15, %v3229_v63  ;;  %v1669_v19 = vpop.f32.mrb[27].mxu0 }
 0xc26   :  { %v4236_v27 = vsub.f32 %v4160_v50, %v1669_v19 }
 0xc27   :  { %1717 = vst.msk [vmem:[#allocation2 + $0x8] sm:$0xff] %vm347_vm2, %v4233_v3  ;;  %v1742_v50 = vsub.f32 %v4233_v3, %v3773_v53 }
 0xc28   :  { %1716 = vst.msk [vmem:[#allocation2] sm:$0xff] %vm347_vm2, %v4236_v27  ;;  %v1741_v7 = vsub.f32 %v4236_v27, %v3769_v52  ;;  %v3232_v16 = vpop.f32.mrb[28].mxu0 }
 0xc29   :  { %v4245_v33 = vsub.f32 %v4169_v11, %v3232_v16  ;;  %v1679_v18 = vpop.f32.mrb[29].mxu0  ;;  %v4318_v16 = vld [vmem:[#allocation6] sm:$0xff] }
 0xc2a   :  { %v4248_v15 = vsub.f32 %v4172_v60, %v1679_v18  ;;  %1751 = vperm.xlu1 %3403, %v1741_v7  }
 0xc2b   :  { %1719 = vst.msk [vmem:[#allocation2 + $0x18] sm:$0xff] %vm347_vm2, %v4245_v33  ;;  %v1744_v60 = vsub.f32 %v4245_v33, %v3781_v55 }
 0xc2c   :  { %1718 = vst.msk [vmem:[#allocation2 + $0x10] sm:$0xff] %vm347_vm2, %v4248_v15  ;;  %v3235_v36 = vpop.f32.mrb[30].mxu0  ;;  %v1743_v47 = vsub.f32 %v4248_v15, %v3777_v54 }
 0xc2d   :  { %v4257_v52 = vsub.f32 %v4181_v24, %v3235_v36  ;;  %v1689_v11 = vpop.f32.mrb[31].mxu0 }
 0xc2e   :  { %v4260_v21 = vsub.f32 %v4184_v14, %v1689_v11  ;;  %1756 = vperm.xlu1 %3403, %v1742_v50  }
 0xc2f   :  { %1721 = vst.msk [vmem:[#allocation2 + $0x28] sm:$0xff] %vm347_vm2, %v4257_v52  ;;  %v1746_v14 = vsub.f32 %v4257_v52, %v3789_v57 }
 0xc30   :  { %1720 = vst.msk [vmem:[#allocation2 + $0x20] sm:$0xff] %vm347_vm2, %v4260_v21  ;;  %v3238_v53 = vpop.f32.mrb[32].mxu0  ;;  %v1745_v57 = vsub.f32 %v4260_v21, %v3785_v56 }
 0xc31   :  { %v4269_v40 = vsub.f32 %v4193_v30, %v3238_v53  ;;  %v1699_v24 = vpop.f32.mrb[33].mxu0 }
 0xc32   :  { %v4272_v41 = vsub.f32 %v4196_v31, %v1699_v24  ;;  %1766 = vperm.xlu1 %3403, %v1744_v60  }
 0xc33   :  { %1723 = vst.msk [vmem:[#allocation2 + $0x38] sm:$0xff] %vm347_vm2, %v4269_v40  ;;  %v1748_v55 = vsub.f32 %v4269_v40, %v3797_v59  ;;  %v1725_v30 = vld [vmem:[#allocation2 + $0x5] ss:$8 sm:$0xf] }
 0xc34   :  { %1722 = vst.msk [vmem:[#allocation2 + $0x30] sm:$0xff] %vm347_vm2, %v4272_v41  ;;  %v1747_v59 = vsub.f32 %v4272_v41, %v3793_v58 }
 0xc36   :  { %1776 = vperm.xlu1 %3403, %v1746_v14   ;;  %v4344_v14 = vld [vmem:[#allocation6 + $0x18] sm:$0xff] }
 0xc3a   :  { %1786 = vperm.xlu1 %3403, %v1748_v55  }
 0xc3b   :  { %v1726_v45 = vld [vmem:[#allocation2 + $0x5] ss:$8 sm:$0xf0] }
 0xc3c   :  { %v4282_v46 = vor.u32 %v1726_v45, %v1725_v30 }
 0xc3e   :  { %3428 = vrcp.f32 %v4282_v46  ;;  %3405 = vset.pattern.permute.xlu1 %v3575_v22 }
 0xc48   :  { %v3429_v31 = vpop.eup %3428 }
 0xc49   :  { %1737 = vperm.xlu0 %3402, %v3429_v31   ;;  %v4358_v31 = vld [vmem:[#allocation6 + $0x28] sm:$0xff] }
 0xc4d   :  { %1761 = vperm.xlu0 %3402, %v1743_v47  }
 0xc51   :  { %1771 = vperm.xlu0 %3402, %v1745_v57   ;;  %v4364_v57 = vld [vmem:[#allocation6 + $0x38] sm:$0xff] }
 0xc55   :  { %1781 = vperm.xlu0 %3402, %v1747_v59  }
 0xc59   :  { %3404 = vset.pattern.permute.xlu0 %v3575_v22 }
 0xca9   :  { %v1752_v51 = vpop.permute.xlu1 %1751 }
 0xcaa   :  { %v1789_v61 = vmul.f32 %v1752_v51, %v3893_v12 }
 0xcac   :  { %3241 = vmatprep.mubr.msk.f32.mxu1 %vm94_vm0, %v1789_v61 }
 0xcad   :  { %v1757_v62 = vpop.permute.xlu1 %1756 }
 0xcae   :  { %v1790_v54 = vmul.f32 %v1757_v62, %v3897_v20  ;;  %v4371_v62 = vld [vmem:[#allocation6 + $0x10] sm:$0xff] }
 0xcb1   :  { %v1767_v13 = vpop.permute.xlu1 %1766 }
 0xcb2   :  { %v1792_v39 = vmul.f32 %v1767_v13, %v3904_v28 }
 0xcb5   :  { %v1777_v58 = vpop.permute.xlu1 %1776 }
 0xcb6   :  { %v1794_v4 = vmul.f32 %v1777_v58, %v3912_v34 }
 0xcb9   :  { %v1787_v2 = vpop.permute.xlu1 %1786 }
 0xcba   :  { %v1796_v9 = vmul.f32 %v1787_v2, %v3920_v38 }
 0xcc8   :  { %v1738_v32 = vpop.permute.xlu0 %1737 }
 0xcc9   :  { %v1740_v26 = vmul.f32 %v1738_v32, %v4282_v46  ;;  %v4375_v32 = vld [vmem:[#allocation6 + $0x20] sm:$0xff] }
 0xccb   :  { %3239 = vmatprep.subr.mxu1 %v1740_v26 }
 0xccc   :  { %3240 = vmatpush3.msra.mxu1 %v1740_v26  ;;  %v1762_v56 = vpop.permute.xlu0 %1761 }
 0xccd   :  { %v1791_v48 = vmul.f32 %v1762_v56, %v3899_v23  ;;  %3242 = vmatmul.mubr.msk.f32.vlgmr.msra.gmra.mrb[28].mxu1 %vm94_vm0, %v1790_v54  ;;  %v4379_v54 = vld [vmem:[#allocation6 + $0x30] sm:$0xff] }
 0xccf   :  { %3244 = vmatprep.mubr.msk.f32.mxu1 %vm94_vm0, %v1791_v48 }
 0xcd0   :  { %v1772_v1 = vpop.permute.xlu0 %1771 }
 0xcd1   :  { %v1793_v5 = vmul.f32 %v1772_v1, %v3906_v29  ;;  %3245 = vmatmul.mubr.msk.f32.gmra.mrb[30].mxu1 %vm94_vm0, %v1792_v39 }
 0xcd3   :  { %3247 = vmatprep.mubr.msk.f32.mxu1 %vm94_vm0, %v1793_v5 }
 0xcd4   :  { %v1782_v6 = vpop.permute.xlu0 %1781 }
 0xcd5   :  { %v1795_v8 = vmul.f32 %v1782_v6, %v3914_v35  ;;  %3248 = vmatmul.mubr.msk.f32.gmra.mrb[32].mxu1 %vm94_vm0, %v1794_v4 }
 0xcd7   :  { %3250 = vmatprep.mubr.msk.f32.mxu1 %vm94_vm0, %v1795_v8 }
 0xcd9   :  { %3251 = vmatmul.mubr.msk.f32.gmra.mrb[34].mxu1 %vm94_vm0, %v1796_v9 }
 0xda0   :  { %v3243_v0 = vpop.f32.mrb[28].mxu1 }
 0xda1   :  { %v4309_v63 = vsub.f32 %v4233_v3, %v3243_v0  ;;  %v1887_v19 = vpop.f32.mrb[29].mxu1 }
 0xda2   :  { %v4312_v7 = vsub.f32 %v4236_v27, %v1887_v19  ;;  %v4330_v27 = vld [vmem:[#allocation6 + $0x8] sm:$0xff] }
 0xda3   :  { %1935 = vst.msk [vmem:[#allocation2 + $0x8] sm:$0xff] %vm347_vm2, %v4309_v63  ;;  %v1960_v60 = vsub.f32 %v4309_v63, %v4330_v27 }
 0xda4   :  { %1934 = vst.msk [vmem:[#allocation2] sm:$0xff] %vm347_vm2, %v4312_v7  ;;  %v1959_v18 = vsub.f32 %v4312_v7, %v4318_v16  ;;  %v3246_v50 = vpop.f32.mrb[30].mxu1 }
 0xda5   :  { %v4323_v36 = vsub.f32 %v4245_v33, %v3246_v50  ;;  %v1897_v3 = vpop.f32.mrb[31].mxu1 }
 0xda6   :  { %v4326_v11 = vsub.f32 %v4248_v15, %v1897_v3  ;;  %1969 = vperm.xlu1 %3405, %v1959_v18  }
 0xda7   :  { %1937 = vst.msk [vmem:[#allocation2 + $0x18] sm:$0xff] %vm347_vm2, %v4323_v36  ;;  %v1962_v55 = vsub.f32 %v4323_v36, %v4344_v14 }
 0xda8   :  { %1936 = vst.msk [vmem:[#allocation2 + $0x10] sm:$0xff] %vm347_vm2, %v4326_v11  ;;  %v3249_v53 = vpop.f32.mrb[32].mxu1  ;;  %v1961_v13 = vsub.f32 %v4326_v11, %v4371_v62 }
 0xda9   :  { %v4337_v33 = vsub.f32 %v4257_v52, %v3249_v53  ;;  %v1907_v24 = vpop.f32.mrb[33].mxu1 }
 0xdaa   :  { %v4340_v15 = vsub.f32 %v4260_v21, %v1907_v24  ;;  %1974 = vperm.xlu1 %3405, %v1960_v60  }
 0xdab   :  { %1939 = vst.msk [vmem:[#allocation2 + $0x28] sm:$0xff] %vm347_vm2, %v4337_v33  ;;  %v1964_v47 = vsub.f32 %v4337_v33, %v4358_v31 }
 0xdac   :  { %1938 = vst.msk [vmem:[#allocation2 + $0x20] sm:$0xff] %vm347_vm2, %v4340_v15  ;;  %v3252_v30 = vpop.f32.mrb[34].mxu1  ;;  %v1963_v26 = vsub.f32 %v4340_v15, %v4375_v32 }
 0xdad   :  { %v4351_v52 = vsub.f32 %v4269_v40, %v3252_v30  ;;  %v1917_v45 = vpop.f32.mrb[35].mxu1 }
 0xdae   :  { %v4354_v21 = vsub.f32 %v4272_v41, %v1917_v45  ;;  %1984 = vperm.xlu1 %3405, %v1962_v55  }
 0xdaf   :  { %1941 = vst.msk [vmem:[#allocation2 + $0x38] sm:$0xff] %vm347_vm2, %v4351_v52  ;;  %v1966_v40 = vsub.f32 %v4351_v52, %v4364_v57  ;;  %v1943_v41 = vld [vmem:[#allocation2 + $0x6] ss:$8 sm:$0xf] }
 0xdb0   :  { %1940 = vst.msk [vmem:[#allocation2 + $0x30] sm:$0xff] %vm347_vm2, %v4354_v21  ;;  %v1965_v56 = vsub.f32 %v4354_v21, %v4379_v54 }
 0xdb2   :  { %1994 = vperm.xlu1 %3405, %v1964_v47  }
 0xdb6   :  { %2004 = vperm.xlu1 %3405, %v1966_v40  }
 0xdb7   :  { %v1944_v59 = vld [vmem:[#allocation2 + $0x6] ss:$8 sm:$0xf0] }
 0xdb8   :  { %v4368_v51 = vor.u32 %v1944_v59, %v1943_v41 }
 0xdba   :  { %3430 = vrcp.f32 %v4368_v51 }
 0xdc4   :  { %v3431_v61 = vpop.eup %3430 }
 0xdc5   :  { %1955 = vperm.xlu0 %3404, %v3431_v61  }
 0xdc9   :  { %1979 = vperm.xlu0 %3404, %v1961_v13   ;;  %v4461_v13 = vld [vmem:[#allocation3] sm:$0xff] }
 0xdcd   :  { %1989 = vperm.xlu0 %3404, %v1963_v26  }
 0xdd1   :  { %1999 = vperm.xlu0 %3404, %v1965_v56  }
 0xe25   :  { %v1970_v48 = vpop.permute.xlu1 %1969 }
 0xe26   :  { %v2007_v58 = vmul.f32 %v1970_v48, %v3893_v12 }
 0xe28   :  { %3255 = vmatprep.mubr.msk.f32.mxu0 %vm94_vm0, %v2007_v58 }
 0xe29   :  { %v1975_v39 = vpop.permute.xlu1 %1974 }
 0xe2a   :  { %v2008_v2 = vmul.f32 %v1975_v39, %v3897_v20  ;;  %v4466_v39 = vld [vmem:[#allocation3 + $0x8] sm:$0xff] }
 0xe2d   :  { %v1985_v1 = vpop.permute.xlu1 %1984 }
 0xe2e   :  { %v2010_v22 = vmul.f32 %v1985_v1, %v3904_v28  ;;  %v3576_v28 = vmov 7   ;;  %v4469_v1 = vld [vmem:[#allocation3 + $0x10] sm:$0xff] }
 0xe2f   :  { %3407 = vset.pattern.permute.xlu1 %v3576_v28  ;;  %3406 = vset.pattern.permute.xlu0 %v3576_v28 }
 0xe31   :  { %v1995_v9 = vpop.permute.xlu1 %1994 }
 0xe32   :  { %v2012_v19 = vmul.f32 %v1995_v9, %v3912_v34  ;;  %v4477_v9 = vld [vmem:[#allocation3 + $0x20] sm:$0xff] }
 0xe35   :  { %v2005_v20 = vpop.permute.xlu1 %2004 }
 0xe36   :  { %v2014_v50 = vmul.f32 %v2005_v20, %v3920_v38 }
 0xe44   :  { %v1956_v5 = vpop.permute.xlu0 %1955 }
 0xe45   :  { %v1958_v4 = vmul.f32 %v1956_v5, %v4368_v51 }
 0xe47   :  { %3253 = vmatprep.subr.mxu0 %v1958_v4 }
 0xe48   :  { %3254 = vmatpush3.msra.mxu0 %v1958_v4  ;;  %v1980_v6 = vpop.permute.xlu0 %1979 }
 0xe49   :  { %v2009_v8 = vmul.f32 %v1980_v6, %v3899_v23  ;;  %3256 = vmatmul.mubr.msk.f32.vlgmr.msra.gmra.mrb[34].mxu0 %vm94_vm0, %v2008_v2  ;;  %v4473_v2 = vld [vmem:[#allocation3 + $0x18] sm:$0xff] }
 0xe4b   :  { %3258 = vmatprep.mubr.msk.f32.mxu0 %vm94_vm0, %v2009_v8 }
 0xe4c   :  { %v1990_v12 = vpop.permute.xlu0 %1989 }
 0xe4d   :  { %v2011_v0 = vmul.f32 %v1990_v12, %v3906_v29  ;;  %3259 = vmatmul.mubr.msk.f32.gmra.mrb[36].mxu0 %vm94_vm0, %v2010_v22  ;;  %v4481_v12 = vld [vmem:[#allocation3 + $0x28] sm:$0xff] }
 0xe4f   :  { %3261 = vmatprep.mubr.msk.f32.mxu0 %vm94_vm0, %v2011_v0 }
 0xe50   :  { %v2000_v18 = vpop.permute.xlu0 %1999 }
 0xe51   :  { %v2013_v23 = vmul.f32 %v2000_v18, %v3914_v35  ;;  %3262 = vmatmul.mubr.msk.f32.gmra.mrb[38].mxu0 %vm94_vm0, %v2012_v19  ;;  %v4485_v18 = vld [vmem:[#allocation3 + $0x30] sm:$0xff] }
 0xe53   :  { %3264 = vmatprep.mubr.msk.f32.mxu0 %vm94_vm0, %v2013_v23 }
 0xe55   :  { %3265 = vmatmul.mubr.msk.f32.gmra.mrb[40].mxu0 %vm94_vm0, %v2014_v50  ;;  %v4489_v50 = vld [vmem:[#allocation3 + $0x38] sm:$0xff] }
 0xe56   :  { %3297 = vmatprep.mubr.msk.f32.mxu0 %vm365_vm8, %v3761_v43 }
 0xf1c   :  { %v3257_v29 = vpop.f32.mrb[34].mxu0 }
 0xf1d   :  { %v4403_v34 = vsub.f32 %v4309_v63, %v3257_v29  ;;  %v2105_v3 = vpop.f32.mrb[35].mxu0 }
 0xf1e   :  { %v4406_v35 = vsub.f32 %v4312_v7, %v2105_v3 }
 0xf1f   :  { %2153 = vst.msk [vmem:[#allocation2 + $0x8] sm:$0xff] %vm347_vm2, %v4403_v34  ;;  %v2178_v7 = vsub.f32 %v4403_v34, %v4330_v27 }
 0xf20   :  { %2152 = vst.msk [vmem:[#allocation2] sm:$0xff] %vm347_vm2, %v4406_v35  ;;  %v2177_v38 = vsub.f32 %v4406_v35, %v4318_v16  ;;  %v3260_v60 = vpop.f32.mrb[36].mxu0 }
 0xf21   :  { %v4415_v53 = vsub.f32 %v4323_v36, %v3260_v60  ;;  %v2115_v24 = vpop.f32.mrb[37].mxu0 }
 0xf22   :  { %v4418_v63 = vsub.f32 %v4326_v11, %v2115_v24  ;;  %2187 = vperm.xlu1 %3407, %v2177_v38  }
 0xf23   :  { %2155 = vst.msk [vmem:[#allocation2 + $0x18] sm:$0xff] %vm347_vm2, %v4415_v53  ;;  %v2180_v11 = vsub.f32 %v4415_v53, %v4344_v14 }
 0xf24   :  { %2154 = vst.msk [vmem:[#allocation2 + $0x10] sm:$0xff] %vm347_vm2, %v4418_v63  ;;  %v3263_v55 = vpop.f32.mrb[38].mxu0  ;;  %v2179_v59 = vsub.f32 %v4418_v63, %v4371_v62 }
 0xf25   :  { %v4427_v16 = vsub.f32 %v4337_v33, %v3263_v55  ;;  %v2125_v36 = vpop.f32.mrb[39].mxu0 }
 0xf26   :  { %v4430_v30 = vsub.f32 %v4340_v15, %v2125_v36  ;;  %2192 = vperm.xlu1 %3407, %v2178_v7  }
 0xf27   :  { %2157 = vst.msk [vmem:[#allocation2 + $0x28] sm:$0xff] %vm347_vm2, %v4427_v16  ;;  %v2182_v15 = vsub.f32 %v4427_v16, %v4358_v31 }
 0xf28   :  { %2156 = vst.msk [vmem:[#allocation2 + $0x20] sm:$0xff] %vm347_vm2, %v4430_v30  ;;  %v3266_v27 = vpop.f32.mrb[40].mxu0  ;;  %v2181_v31 = vsub.f32 %v4430_v30, %v4375_v32 }
 0xf29   :  { %v4439_v45 = vsub.f32 %v4351_v52, %v3266_v27  ;;  %v2135_v33 = vpop.f32.mrb[41].mxu0 }
 0xf2a   :  { %v4442_v47 = vsub.f32 %v4354_v21, %v2135_v33  ;;  %2202 = vperm.xlu1 %3407, %v2180_v11   ;;  %v856_v33 = vmul.f32 6.2831855, %v3976_v49  ;;  %v1728_v49 = vmul.f32 6.2831855, %v4282_v46 }
 0xf2b   :  { %2159 = vst.msk [vmem:[#allocation2 + $0x38] sm:$0xff] %vm347_vm2, %v4439_v45  ;;  %v2184_v14 = vsub.f32 %v4439_v45, %v4364_v57  ;;  %v2161_v52 = vld [vmem:[#allocation2 + $0x7] ss:$8 sm:$0xf] }
 0xf2c   :  { %2158 = vst.msk [vmem:[#allocation2 + $0x30] sm:$0xff] %vm347_vm2, %v4442_v47  ;;  %v2183_v57 = vsub.f32 %v4442_v47, %v4379_v54 }
 0xf2e   :  { %2212 = vperm.xlu1 %3407, %v2182_v15   ;;  %v1510_v15 = vmul.f32 6.2831855, %v4206_v37 }
 0xf32   :  { %2222 = vperm.xlu1 %3407, %v2184_v14  }
 0xf33   :  { %v2162_v40 = vld [vmem:[#allocation2 + $0x7] ss:$8 sm:$0xf0] }
 0xf34   :  { %v4452_v41 = vor.u32 %v2162_v40, %v2161_v52  ;;  %v1292_v52 = vmul.f32 6.2831855, %v4130_v25 }
 0xf36   :  { %3432 = vrcp.f32 %v4452_v41  ;;  %v2164_v37 = vmul.f32 6.2831855, %v4452_v41 }
 0xf40   :  { %v3433_v21 = vpop.eup %3432 }
 0xf41   :  { %2173 = vperm.xlu0 %3406, %v3433_v21   ;;  %v1946_v21 = vmul.f32 6.2831855, %v4368_v51 }
 0xf45   :  { %2197 = vperm.xlu0 %3406, %v2179_v59  }
 0xf49   :  { %2207 = vperm.xlu0 %3406, %v2181_v31  }
 0xf4d   :  { %2217 = vperm.xlu0 %3406, %v2183_v57  }
 0xfa1   :  { %v2188_v61 = vpop.permute.xlu1 %2187 }
 0xfa2   :  { %v2225_v26 = vmul.f32 %v4461_v13, %v2188_v61 }
 0xfa4   :  { %3269 = vmatprep.mubr.msk.f32.mxu1 %vm94_vm0, %v2225_v26 }
 0xfa5   :  { %v2193_v56 = vpop.permute.xlu1 %2192 }
 0xfa6   :  { %v2226_v32 = vmul.f32 %v4466_v39, %v2193_v56 }
 0xfa9   :  { %v2203_v48 = vpop.permute.xlu1 %2202 }
 0xfaa   :  { %v2228_v6 = vmul.f32 %v4473_v2, %v2203_v48 }
 0xfad   :  { %v2213_v4 = vpop.permute.xlu1 %2212 }
 0xfae   :  { %v2230_v0 = vmul.f32 %v4481_v12, %v2213_v4 }
 0xfb1   :  { %v2223_v19 = vpop.permute.xlu1 %2222 }
 0xfb2   :  { %v2232_v28 = vmul.f32 %v4489_v50, %v2223_v19  ;;  %v2602_v19 = vld [vmem:[#allocation8] sm:$0xff] }
 0xfc0   :  { %v2174_v58 = vpop.permute.xlu0 %2173 }
 0xfc1   :  { %v2176_v62 = vmul.f32 %v2174_v58, %v4452_v41 }
 0xfc3   :  { %3267 = vmatprep.subr.mxu1 %v2176_v62 }
 0xfc4   :  { %3268 = vmatpush3.msra.mxu1 %v2176_v62  ;;  %v2198_v54 = vpop.permute.xlu0 %2197 }
 0xfc5   :  { %v2227_v5 = vmul.f32 %v4469_v1, %v2198_v54  ;;  %3270 = vmatmul.mubr.msk.f32.vlgmr.msra.gmra.mrb[36].mxu1 %vm94_vm0, %v2226_v32 }
 0xfc7   :  { %3272 = vmatprep.mubr.msk.f32.mxu1 %vm94_vm0, %v2227_v5 }
 0xfc8   :  { %v2208_v8 = vpop.permute.xlu0 %2207 }
 0xfc9   :  { %v2229_v22 = vmul.f32 %v4477_v9, %v2208_v8  ;;  %3273 = vmatmul.mubr.msk.f32.gmra.mrb[38].mxu1 %vm94_vm0, %v2228_v6  ;;  %v2603_v6 = vld [vmem:[#allocation8 + $0x8] sm:$0xff] }
 0xfcb   :  { %3275 = vmatprep.mubr.msk.f32.mxu1 %vm94_vm0, %v2229_v22 }
 0xfcc   :  { %v2218_v20 = vpop.permute.xlu0 %2217 }
 0xfcd   :  { %v2231_v23 = vmul.f32 %v4485_v18, %v2218_v20  ;;  %3276 = vmatmul.mubr.msk.f32.gmra.mrb[40].mxu1 %vm94_vm0, %v2230_v0 }
 0xfcf   :  { %3278 = vmatprep.mubr.msk.f32.mxu1 %vm94_vm0, %v2231_v23 }
 0xfd1   :  { %3279 = vmatmul.mubr.msk.f32.gmra.mrb[42].mxu1 %vm94_vm0, %v2232_v28 }
0x1098   :  { %v3271_v29 = vpop.f32.mrb[36].mxu1 }
0x1099   :  { %v4495_v3 = vsub.f32 %v4403_v34, %v3271_v29  ;;  %v2323_v38 = vpop.f32.mrb[37].mxu1 }
0x109a   :  { %v4498_v60 = vsub.f32 %v4406_v35, %v2323_v38 }
0x109b   :  { %2380 = vrot.lane.b32.xlu1 %v4495_v3, %s3577_s26 }
0x109c   :  { %2378 = vrot.lane.b32.xlu0 %v4498_v60, %s3577_s26  ;;  %v3274_v24 = vpop.f32.mrb[38].mxu1 }
0x109d   :  { %v2333_v7 = vpop.f32.mrb[39].mxu1  ;;  %v4529_v11 = vsub.f32 %v4415_v53, %v3274_v24 }
0x109e   :  { %v4532_v27 = vsub.f32 %v4418_v63, %v2333_v7 }
0x109f   :  { %2404 = vrot.lane.b32.xlu1 %v4495_v3, %s3557_s14 }
0x10a0   :  { %2402 = vrot.lane.b32.xlu0 %v4498_v60, %s3557_s14  ;;  %v3277_v34 = vpop.f32.mrb[40].mxu1 }
0x10a1   :  { %v2343_v55 = vpop.f32.mrb[41].mxu1  ;;  %v4563_v53 = vsub.f32 %v4427_v16, %v3277_v34 }
0x10a2   :  { %v4566_v63 = vsub.f32 %v4430_v30, %v2343_v55 }
0x10a3   :  { %2428 = vrot.lane.b32.xlu1 %v4495_v3, %s3562_s22 }
0x10a4   :  { %2426 = vrot.lane.b32.xlu0 %v4498_v60, %s3562_s22  ;;  %v3280_v35 = vpop.f32.mrb[42].mxu1 }
0x10a5   :  { %v2353_v36 = vpop.f32.mrb[43].mxu1  ;;  %v4597_v16 = vsub.f32 %v4439_v45, %v3280_v35  ;;  %v1074_v45 = vmul.f32 6.2831855, %v4054_v17 }
0x10a6   :  { %v4600_v30 = vsub.f32 %v4442_v47, %v2353_v36 }
0x10a7   :  { %2452 = vrot.lane.b32.xlu1 %v4495_v3, %s3559_s6 }
0x10a8   :  { %2450 = vrot.lane.b32.xlu0 %v4498_v60, %s3559_s6 }
0x10ab   :  { %2476 = vrot.lane.b32.xlu1 %v4495_v3, %s3560_s2 }
0x10ac   :  { %2474 = vrot.lane.b32.xlu0 %v4498_v60, %s3560_s2 }
0x10af   :  { %2500 = vrot.lane.b32.xlu1 %v4495_v3, %s3561_s13 }
0x10b0   :  { %2498 = vrot.lane.b32.xlu0 %v4498_v60, %s3561_s13 }
0x10b3   :  { %2524 = vrot.lane.b32.xlu1 %v4495_v3, %s3563_s23 }
0x10b4   :  { %2522 = vrot.lane.b32.xlu0 %v4498_v60, %s3563_s23 }
0x10b7   :  { %2384 = vrot.lane.b32.xlu1 %v4529_v11, %s3577_s26 }
0x10b8   :  { %2382 = vrot.lane.b32.xlu0 %v4532_v27, %s3577_s26 }
0x10bb   :  { %2408 = vrot.lane.b32.xlu1 %v4529_v11, %s3557_s14 }
0x10bc   :  { %2406 = vrot.lane.b32.xlu0 %v4532_v27, %s3557_s14 }
0x10bf   :  { %2432 = vrot.lane.b32.xlu1 %v4529_v11, %s3562_s22 }
0x10c0   :  { %2430 = vrot.lane.b32.xlu0 %v4532_v27, %s3562_s22 }
0x10c3   :  { %2456 = vrot.lane.b32.xlu1 %v4529_v11, %s3559_s6 }
0x10c4   :  { %2454 = vrot.lane.b32.xlu0 %v4532_v27, %s3559_s6 }
0x10c7   :  { %2480 = vrot.lane.b32.xlu1 %v4529_v11, %s3560_s2 }
0x10c8   :  { %2478 = vrot.lane.b32.xlu0 %v4532_v27, %s3560_s2 }
0x10cb   :  { %2504 = vrot.lane.b32.xlu1 %v4529_v11, %s3561_s13 }
0x10cc   :  { %2502 = vrot.lane.b32.xlu0 %v4532_v27, %s3561_s13 }
0x10cf   :  { %2528 = vrot.lane.b32.xlu1 %v4529_v11, %s3563_s23 }
0x10d0   :  { %2526 = vrot.lane.b32.xlu0 %v4532_v27, %s3563_s23 }
0x10d3   :  { %2388 = vrot.lane.b32.xlu1 %v4563_v53, %s3577_s26 }
0x10d4   :  { %2386 = vrot.lane.b32.xlu0 %v4566_v63, %s3577_s26 }
0x10d7   :  { %2412 = vrot.lane.b32.xlu1 %v4563_v53, %s3557_s14 }
0x10d8   :  { %2410 = vrot.lane.b32.xlu0 %v4566_v63, %s3557_s14 }
0x10db   :  { %2436 = vrot.lane.b32.xlu1 %v4563_v53, %s3562_s22 }
0x10dc   :  { %2434 = vrot.lane.b32.xlu0 %v4566_v63, %s3562_s22 }
0x10df   :  { %2460 = vrot.lane.b32.xlu1 %v4563_v53, %s3559_s6 }
0x10e0   :  { %2458 = vrot.lane.b32.xlu0 %v4566_v63, %s3559_s6 }
0x10e3   :  { %2484 = vrot.lane.b32.xlu1 %v4563_v53, %s3560_s2 }
0x10e4   :  { %2482 = vrot.lane.b32.xlu0 %v4566_v63, %s3560_s2 }
0x10e7   :  { %2508 = vrot.lane.b32.xlu1 %v4563_v53, %s3561_s13 }
0x10e8   :  { %2506 = vrot.lane.b32.xlu0 %v4566_v63, %s3561_s13 }
0x10eb   :  { %2532 = vrot.lane.b32.xlu1 %v4563_v53, %s3563_s23 }
0x10ec   :  { %2530 = vrot.lane.b32.xlu0 %v4566_v63, %s3563_s23 }
0x10ef   :  { %2392 = vrot.lane.b32.xlu1 %v4597_v16, %s3577_s26 }
0x10f0   :  { %2390 = vrot.lane.b32.xlu0 %v4600_v30, %s3577_s26 }
0x10f3   :  { %2416 = vrot.lane.b32.xlu1 %v4597_v16, %s3557_s14 }
0x10f4   :  { %2414 = vrot.lane.b32.xlu0 %v4600_v30, %s3557_s14 }
0x10f7   :  { %2440 = vrot.lane.b32.xlu1 %v4597_v16, %s3562_s22 }
0x10f8   :  { %2438 = vrot.lane.b32.xlu0 %v4600_v30, %s3562_s22 }
0x10fb   :  { %2464 = vrot.lane.b32.xlu1 %v4597_v16, %s3559_s6 }
0x10fc   :  { %2462 = vrot.lane.b32.xlu0 %v4600_v30, %s3559_s6 }
0x10ff   :  { %2488 = vrot.lane.b32.xlu1 %v4597_v16, %s3560_s2 }
0x1100   :  { %2486 = vrot.lane.b32.xlu0 %v4600_v30, %s3560_s2 }
0x1103   :  { %2512 = vrot.lane.b32.xlu1 %v4597_v16, %s3561_s13 }
0x1104   :  { %2510 = vrot.lane.b32.xlu0 %v4600_v30, %s3561_s13 }
0x1107   :  { %2536 = vrot.lane.b32.xlu1 %v4597_v16, %s3563_s23 }
0x1108   :  { %2534 = vrot.lane.b32.xlu0 %v4600_v30, %s3563_s23 }
0x110b   :  { %1076 = vrot.lane.b32.xlu1 %v1074_v45, %s3578_s28 }
0x110c   :  { %858 = vrot.lane.b32.xlu0 %v856_v33, %s3579_s29 }
0x110d   :  { %v2381_v47 = vpop.permute.xlu1 %2380 }
0x110e   :  { %v2379_v14 = vpop.permute.xlu0 %2378  ;;  %v2547_v51 = vsel %vm94_vm0, %v2381_v47, %v4495_v3 }
0x110f   :  { %1512 = vrot.lane.b32.xlu1 %v1510_v15, %s3580_s30  ;;  %v2546_v46 = vsel %vm94_vm0, %v2379_v14, %v4498_v60 }
0x1110   :  { %1294 = vrot.lane.b32.xlu0 %v1292_v52, %s3581_s8 }
0x1111   :  { %v2405_v40 = vpop.permute.xlu1 %2404 }
0x1112   :  { %v2403_v17 = vpop.permute.xlu0 %2402  ;;  %v2555_v56 = vsel %vm347_vm2, %v2547_v51, %v2405_v40  ;;  %v2604_v51 = vld [vmem:[#allocation8 + $0x10] sm:$0xff] }
0x1113   :  { %1948 = vrot.lane.b32.xlu1 %v1946_v21, %s3582_s9  ;;  %v2554_v58 = vsel %vm347_vm2, %v2546_v46, %v2403_v17 }
0x1114   :  { %1730 = vrot.lane.b32.xlu0 %v1728_v49, %s3583_s10 }
0x1115   :  { %v2429_v59 = vpop.permute.xlu1 %2428 }
0x1116   :  { %v2427_v31 = vpop.permute.xlu0 %2426  ;;  %v2563_v62 = vsel %vm350_vm3, %v2555_v56, %v2429_v59 }
0x1117   :  { %v2562_v32 = vsel %vm350_vm3, %v2554_v58, %v2427_v31 }
0x1118   :  { %2166 = vrot.lane.b32.xlu0 %v2164_v37, %s3584_s11 }
0x1119   :  { %v2453_v25 = vpop.permute.xlu1 %2452 }
0x111a   :  { %v2451_v57 = vpop.permute.xlu0 %2450  ;;  %v2571_v54 = vsel %vm353_vm4, %v2563_v62, %v2453_v25 }
0x111b   :  { %v2570_v5 = vsel %vm353_vm4, %v2562_v32, %v2451_v57 }
0x111d   :  { %v2477_v61 = vpop.permute.xlu1 %2476 }
0x111e   :  { %v2475_v26 = vpop.permute.xlu0 %2474  ;;  %v2579_v4 = vsel %vm356_vm5, %v2571_v54, %v2477_v61 }
0x111f   :  { %v2578_v8 = vsel %vm356_vm5, %v2570_v5, %v2475_v26 }
0x1121   :  { %v2501_v48 = vpop.permute.xlu1 %2500 }
0x1122   :  { %v2499_v41 = vpop.permute.xlu0 %2498  ;;  %v2587_v22 = vsel %vm359_vm6, %v2579_v4, %v2501_v48 }
0x1123   :  { %v2586_v20 = vsel %vm359_vm6, %v2578_v8, %v2499_v41 }
0x1125   :  { %v2525_v0 = vpop.permute.xlu1 %2524 }
0x1126   :  { %v2595_v23 = vsel %vm362_vm7, %v2587_v22, %v2525_v0  ;;  %v2523_v28 = vpop.permute.xlu0 %2522 }
0x1127   :  { %v2611_v29 = vmul.f32 %v2603_v6, %v2595_v23  ;;  %v2594_v3 = vsel %vm362_vm7, %v2586_v20, %v2523_v28 }
0x1128   :  { %v2610_v38 = vmul.f32 %v2602_v19, %v2594_v3 }
0x1129   :  { %v2385_v60 = vpop.permute.xlu1 %2384 }
0x112a   :  { %v2383_v24 = vpop.permute.xlu0 %2382  ;;  %v3327_v7 = vpack.c.bf16 %v2611_v29, %v2610_v38  ;;  %v2549_v14 = vsel %vm94_vm0, %v2385_v60, %v4529_v11  ;;  %v2605_v11 = vld [vmem:[#allocation8 + $0x18] sm:$0xff] }
0x112b   :  { %v2548_v52 = vsel %vm94_vm0, %v2383_v24, %v4532_v27 }
0x112c   :  { %3328 = vmatprep.subr.bf16.mxu0 %v3327_v7 }
0x112d   :  { %3330 = vmatpush3.bf16.msra.mxu0 %v3327_v7  ;;  %v2409_v34 = vpop.permute.xlu1 %2408 }
0x112e   :  { %v2407_v55 = vpop.permute.xlu0 %2406  ;;  %v2557_v40 = vsel %vm347_vm2, %v2549_v14, %v2409_v34 }
0x112f   :  { %v2556_v17 = vsel %vm347_vm2, %v2548_v52, %v2407_v55 }
0x1131   :  { %v2433_v35 = vpop.permute.xlu1 %2432 }
0x1132   :  { %v2431_v36 = vpop.permute.xlu0 %2430  ;;  %v2565_v49 = vsel %vm350_vm3, %v2557_v40, %v2433_v35 }
0x1133   :  { %v2564_v31 = vsel %vm350_vm3, %v2556_v17, %v2431_v36 }
0x1135   :  { %v2457_v45 = vpop.permute.xlu1 %2456 }
0x1136   :  { %v2455_v33 = vpop.permute.xlu0 %2454  ;;  %v2573_v37 = vsel %vm353_vm4, %v2565_v49, %v2457_v45 }
0x1137   :  { %v2572_v25 = vsel %vm353_vm4, %v2564_v31, %v2455_v33 }
0x1139   :  { %v2481_v47 = vpop.permute.xlu1 %2480 }
0x113a   :  { %v2479_v15 = vpop.permute.xlu0 %2478  ;;  %v2581_v57 = vsel %vm356_vm5, %v2573_v37, %v2481_v47  ;;  %v2606_v47 = vld [vmem:[#allocation8 + $0x20] sm:$0xff] }
0x113b   :  { %v2580_v61 = vsel %vm356_vm5, %v2572_v25, %v2479_v15 }
0x113d   :  { %v2505_v21 = vpop.permute.xlu1 %2504 }
0x113e   :  { %v2503_v59 = vpop.permute.xlu0 %2502  ;;  %v2589_v27 = vsel %vm359_vm6, %v2581_v57, %v2505_v21 }
0x113f   :  { %v2588_v46 = vsel %vm359_vm6, %v2580_v61, %v2503_v59 }
0x1141   :  { %v2529_v26 = vpop.permute.xlu1 %2528 }
0x1142   :  { %v2597_v56 = vsel %vm362_vm7, %v2589_v27, %v2529_v26  ;;  %v2527_v48 = vpop.permute.xlu0 %2526 }
0x1143   :  { %v2613_v58 = vmul.f32 %v2605_v11, %v2597_v56  ;;  %v2596_v62 = vsel %vm362_vm7, %v2588_v46, %v2527_v48 }
0x1144   :  { %v2612_v41 = vmul.f32 %v2604_v51, %v2596_v62 }
0x1145   :  { %v2389_v32 = vpop.permute.xlu1 %2388 }
0x1146   :  { %v2387_v54 = vpop.permute.xlu0 %2386  ;;  %v3331_v5 = vpack.c.bf16 %v2613_v58, %v2612_v41  ;;  %v2551_v28 = vsel %vm94_vm0, %v2389_v32, %v4563_v53  ;;  %v2607_v53 = vld [vmem:[#allocation8 + $0x28] sm:$0xff] }
0x1147   :  { %v2550_v29 = vsel %vm94_vm0, %v2387_v54, %v4566_v63 }
0x1148   :  { %3332 = vmatprep.subr.bf16.mxu0 %v3331_v5 }
0x1149   :  { %3334 = vmatpush3.bf16.msra.mxu0 %v3331_v5  ;;  %v2413_v4 = vpop.permute.xlu1 %2412 }
0x114a   :  { %v2411_v6 = vpop.permute.xlu0 %2410  ;;  %v2559_v3 = vsel %vm347_vm2, %v2551_v28, %v2413_v4 }
0x114b   :  { %v2558_v60 = vsel %vm347_vm2, %v2550_v29, %v2411_v6 }
0x114d   :  { %v2437_v8 = vpop.permute.xlu1 %2436 }
0x114e   :  { %v2435_v22 = vpop.permute.xlu0 %2434  ;;  %v2567_v24 = vsel %vm350_vm3, %v2559_v3, %v2437_v8 }
0x114f   :  { %v2566_v34 = vsel %vm350_vm3, %v2558_v60, %v2435_v22  ;;  %v643_v60 = vmul.f32 6.2831855, %v3890_v10 }
0x1151   :  { %v2461_v0 = vpop.permute.xlu1 %2460 }
0x1152   :  { %v2459_v19 = vpop.permute.xlu0 %2458  ;;  %v2575_v55 = vsel %vm353_vm4, %v2567_v24, %v2461_v0  ;;  %v2608_v0 = vld [vmem:[#allocation8 + $0x30] sm:$0xff] }
0x1153   :  { %v2574_v35 = vsel %vm353_vm4, %v2566_v34, %v2459_v19 }
0x1155   :  { %v2485_v20 = vpop.permute.xlu1 %2484 }
0x1156   :  { %v2483_v23 = vpop.permute.xlu0 %2482  ;;  %v2583_v36 = vsel %vm356_vm5, %v2575_v55, %v2485_v20 }
0x1157   :  { %v2582_v45 = vsel %vm356_vm5, %v2574_v35, %v2483_v23 }
0x1159   :  { %v2509_v38 = vpop.permute.xlu1 %2508 }
0x115a   :  { %v2507_v7 = vpop.permute.xlu0 %2506  ;;  %v2591_v63 = vsel %vm359_vm6, %v2583_v36, %v2509_v38 }
0x115b   :  { %v2590_v15 = vsel %vm359_vm6, %v2582_v45, %v2507_v7 }
0x115d   :  { %v2533_v33 = vpop.permute.xlu1 %2532 }
0x115e   :  { %v2599_v14 = vsel %vm362_vm7, %v2591_v63, %v2533_v33  ;;  %v2531_v52 = vpop.permute.xlu0 %2530 }
0x115f   :  { %v2615_v40 = vmul.f32 %v2607_v53, %v2599_v14  ;;  %v2598_v21 = vsel %vm362_vm7, %v2590_v15, %v2531_v52 }
0x1160   :  { %v2614_v17 = vmul.f32 %v2606_v47, %v2598_v21  ;;  %v3347_v21 = vpack.c.bf16 %v4473_v2, %v4469_v1 }
0x1161   :  { %v2393_v49 = vpop.permute.xlu1 %2392 }
0x1162   :  { %v2391_v59 = vpop.permute.xlu0 %2390  ;;  %v3335_v31 = vpack.c.bf16 %v2615_v40, %v2614_v17  ;;  %v2553_v46 = vsel %vm94_vm0, %v2393_v49, %v4597_v16  ;;  %v2609_v16 = vld [vmem:[#allocation8 + $0x38] sm:$0xff]  ;;  %v3343_v40 = vpack.c.bf16 %v4466_v39, %v4461_v13  ;;  %v3351_v17 = vpack.c.bf16 %v4481_v12, %v4477_v9 }
0x1163   :  { %v2552_v56 = vsel %vm94_vm0, %v2391_v59, %v4600_v30  ;;  %v3355_v59 = vpack.c.bf16 %v4489_v50, %v4485_v18 }
0x1164   :  { %3336 = vmatprep.subr.bf16.mxu0 %v3335_v31  ;;  %3344 = vmatprep.subr.bf16.mxu1 %v3343_v40 }
0x1165   :  { %3338 = vmatpush3.bf16.msra.mxu0 %v3335_v31  ;;  %v2417_v37 = vpop.permute.xlu1 %2416  ;;  %3346 = vmatpush3.bf16.msra.mxu1 %v3343_v40 }
0x1166   :  { %v2415_v25 = vpop.permute.xlu0 %2414  ;;  %v2561_v48 = vsel %vm347_vm2, %v2553_v46, %v2417_v37  ;;  %3348 = vmatprep.subr.bf16.mxu1 %v3347_v21 }
0x1167   :  { %v2560_v62 = vsel %vm347_vm2, %v2552_v56, %v2415_v25 }
0x1169   :  { %v2441_v57 = vpop.permute.xlu1 %2440  ;;  %3350 = vmatpush3.bf16.msra.mxu1 %v3347_v21 }
0x116a   :  { %v2439_v11 = vpop.permute.xlu0 %2438  ;;  %v2569_v41 = vsel %vm350_vm3, %v2561_v48, %v2441_v57  ;;  %3352 = vmatprep.subr.bf16.mxu1 %v3351_v17 }
0x116b   :  { %v2568_v54 = vsel %vm350_vm3, %v2560_v62, %v2439_v11 }
0x116d   :  { %v2465_v61 = vpop.permute.xlu1 %2464  ;;  %3354 = vmatpush3.bf16.msra.mxu1 %v3351_v17 }
0x116e   :  { %v2463_v27 = vpop.permute.xlu0 %2462  ;;  %v2577_v5 = vsel %vm353_vm4, %v2569_v41, %v2465_v61  ;;  %3356 = vmatprep.subr.bf16.mxu1 %v3355_v59 }
0x116f   :  { %v2576_v4 = vsel %vm353_vm4, %v2568_v54, %v2463_v27 }
0x1171   :  { %v2489_v26 = vpop.permute.xlu1 %2488  ;;  %3358 = vmatpush3.bf16.msra.mxu1 %v3355_v59 }
0x1172   :  { %v2487_v51 = vpop.permute.xlu0 %2486  ;;  %v2585_v6 = vsel %vm356_vm5, %v2577_v5, %v2489_v26 }
0x1173   :  { %v2584_v8 = vsel %vm356_vm5, %v2576_v4, %v2487_v51 }
0x1175   :  { %v2513_v58 = vpop.permute.xlu1 %2512 }
0x1176   :  { %v2511_v32 = vpop.permute.xlu0 %2510  ;;  %v2593_v30 = vsel %vm359_vm6, %v2585_v6, %v2513_v58 }
0x1177   :  { %v2592_v19 = vsel %vm359_vm6, %v2584_v8, %v2511_v32 }
0x1179   :  { %v2537_v22 = vpop.permute.xlu1 %2536 }
0x117a   :  { %v2601_v20 = vsel %vm362_vm7, %v2593_v30, %v2537_v22  ;;  %v2535_v23 = vpop.permute.xlu0 %2534 }
0x117b   :  { %v2617_v28 = vmul.f32 %v2609_v16, %v2601_v20  ;;  %v2600_v29 = vsel %vm362_vm7, %v2592_v19, %v2535_v23 }
0x117c   :  { %v2616_v3 = vmul.f32 %v2608_v0, %v2600_v29 }
0x117d   :  { %v1077_v38 = vpop.permute.xlu1 %1076 }
0x117e   :  { %v859_v24 = vpop.permute.xlu0 %858  ;;  %v3339_v7 = vpack.c.bf16 %v2617_v28, %v2616_v3 }
0x117f   :  { %v861_v34 = vmul.f32 %v859_v24, %v643_v60 }
0x1180   :  { %3340 = vmatprep.subr.bf16.mxu0 %v3339_v7 }
0x1181   :  { %3342 = vmatpush3.bf16.msra.mxu0 %v3339_v7  ;;  %v1079_v55 = vmul.f32 %v1077_v38, %v861_v34  ;;  %v1513_v35 = vpop.permute.xlu1 %1512 }
0x1182   :  { %v1295_v36 = vpop.permute.xlu0 %1294 }
0x1183   :  { %v1297_v53 = vmul.f32 %v1295_v36, %v1079_v55 }
0x1184   :  { %3298 = vmatmul.mubr.msk.f32.vlgmr.msra.gmra.mrb[42].mxu0 %vm365_vm8, %v3763_v44 }
0x1185   :  { %v1515_v45 = vmul.f32 %v1513_v35, %v1297_v53  ;;  %v1949_v47 = vpop.permute.xlu1 %1948 }
0x1186   :  { %v1731_v63 = vpop.permute.xlu0 %1730 }
0x1187   :  { %v1733_v33 = vmul.f32 %v1731_v63, %v1515_v45 }
0x1189   :  { %v1951_v15 = vmul.f32 %v1949_v47, %v1733_v33 }
0x118a   :  { %v2167_v14 = vpop.permute.xlu0 %2166 }
0x118b   :  { %v2169_v52 = vmul.f32 %v2167_v14, %v1951_v15 }
0x118d   :  { %v2799_v10 = vand.u32 2147483647, %v2169_v52 }
0x118f   :  { %3434 = vrsqrt.f32 %v2799_v10 }
0x1199   :  { %v3435_v49 = vpop.eup %3434 }
0x119a   :  { %2802 = vrot.lane.b32.xlu1 %v3435_v49, %s3557_s14  ;;  %s3585_s14 = smov [#allocation9]  }
0x119b   :  { %s2921_s12 = sshll.u32 %s3585_s14, 4  ;;  %s2922_s12 = int_to_ptr.vmem [resolvable:$true] %s2921_s12 }
0x119c   :  { %s3526_s4 = scalar_lea.vmem %s2922_s12, 16  ;;  %s3530_s27 = scalar_lea.vmem %s2922_s12, 32 }
0x119d   :  { %p3527_p10 = scmp.ne.s32.totalorder %s2922_s12, %s3526_s4  ;;  %p3531_p11 = scmp.lt.s32.totalorder %s2922_s12, %s2922_s12 }
0x119e   :  { %p3532_p12 = scmp.lt.s32.totalorder %s3530_s27, %s3526_s4 }
0x11a0   :  { %p3533_p13 = por %p3532_p12, %p3531_p11 }
0x11a2   :  { %p3534_p0 = pnand %p3533_p13, %p3527_p10 }
0x120c   :  { %v2803_v11 = vpop.permute.xlu1 %2802 }
0x1257   :  { %v3299_v13 = vpop.f32.mrb[42].mxu0 }
0x1258   :  { %v2690_v39 = vpop.f32.mrb[43].mxu0  ;;  %v2700_v2 = vmul.f32 %v3299_v13, %v3763_v44 }
0x1259   :  { %v2699_v1 = vmul.f32 %v2690_v39, %v3761_v43  ;;  %v2798_v43 = vmul.f32 0.0625, %v3926_v42 }
0x125b   :  { %3316 = vmatprep.mubr.msk.f32.mxu1 %vm365_vm8, %v2699_v1  ;;  %v2805_v44 = vmul.f32 %v2803_v11, %v2798_v43 }
0x125c   :  { %3317 = vmatmul.mubr.msk.f32.vlgmr.msra.gmra.mrb[44].mxu1 %vm365_vm8, %v2700_v2 }
0x132f   :  { %v3318_v9 = vpop.f32.mrb[44].mxu1 }
0x1330   :  { %v2783_v12 = vmul.f32 -0.5, %v3318_v9  ;;  %v2773_v31 = vpop.f32.mrb[45].mxu1 }
0x1331   :  { %v2782_v37 = vmul.f32 -0.5, %v2773_v31 }
0x1332   :  { %v2785_v25 = vmax.f32 %v2783_v12, 0.0 }
0x1333   :  { %v2784_v57 = vmax.f32 %v2782_v37, 0.0 }
0x1334   :  { %v2789_v18 = vsel %vm94_vm0, %v2785_v25, -inf }
0x1335   :  { %2790 = vmax.xlane.f32.xlu1 %v2789_v18  ;;  %v2786_v50 = vsel %vm94_vm0, %v2784_v57, -inf }
0x1336   :  { %2787 = vmax.xlane.f32.xlu0 %v2786_v50 }
0x134c   :  { %2809 = vrot.lane.b32.xlu0 %v2805_v44, %s3577_s26 }
0x13c2   :  { %v2791_v61 = vpop.xlane.xlu1 %2790 }
0x13c3   :  { %v2793_v27 = vsub.f32 %v2783_v12, %v2791_v61  ;;  %v2788_v26 = vpop.xlane.xlu0 %2787  ;;  %v2807_v6 = vsub.f32 0.0, %v2791_v61 }
0x13c4   :  { %v2792_v51 = vsub.f32 %v2782_v37, %v2788_v26  ;;  %v2806_v8 = vsub.f32 0.0, %v2788_v26 }
0x13c5   :  { %v2796_v46 = vmul.f32 1.442695, %v2793_v27 }
0x13c6   :  { %v2794_v56 = vmul.f32 1.442695, %v2792_v51 }
0x13c7   :  { %v2810_v48 = vpop.permute.xlu0 %2809 }
0x13c8   :  { %3436 = vpow2.f32 %v2794_v56  ;;  %3319 = vmatprep.subr.mxu0 %v2810_v48 }
0x13c9   :  { %3438 = vpow2.f32 %v2796_v46  ;;  %3320 = vmatpush3.msra.mxu0 %v2810_v48 }
0x13d2   :  { %v3437_v58 = vpop.eup %3436 }
0x13d3   :  { %v3439_v62 = vpop.eup %3438  ;;  %3321 = vmatprep.mubr.msk.f32.mxu0 %vm94_vm0, %v3437_v58 }
0x13d4   :  { %3322 = vmatmul.mubr.msk.f32.vlgmr.msra.gmra.mrb[44].mxu0 %vm94_vm0, %v3439_v62 }
0x14a7   :  { %v3323_v42 = vpop.f32.mrb[44].mxu0 }
0x14a8   :  { %v2890_v41 = vadd.f32 1e-05, %v3323_v42  ;;  %v2884_v32 = vpop.f32.mrb[45].mxu0 }
0x14a9   :  { %v2885_v54 = vadd.f32 1e-05, %v2884_v32 }
0x14aa   :  { %3440 = vlog2.f32 %v2890_v41 }
0x14ab   :  { %3442 = vlog2.f32 %v2885_v54 }
0x14b4   :  { %v3441_v5 = vpop.eup %3440 }
0x14b5   :  { %v3443_v4 = vpop.eup %3442  ;;  %v2896_v16 = vmul.f32 0.6931472, %v3441_v5 }
0x14b6   :  { %v2894_v30 = vmul.f32 0.6931472, %v3443_v4 }
0x14b7   :  { %v2898_v22 = vsub.f32 %v2807_v6, %v2896_v16 }
0x14b8   :  { %v2897_v0 = vsub.f32 %v2806_v8, %v2894_v30 }
0x14b9   :  { %v2901_v19 = vsel %vm2899_vm9, %v2898_v22, 0.0 }
0x14ba   :  { %v2900_v20 = vsel %vm2899_vm9, %v2897_v0, 0.0 }
0x14bb   :  { %v2902_v23 = vadd.f32 %v2901_v19, %v2900_v20 }
0x14bd   :  { %2903 = vadd.xlane.f32.xlu1 %v2902_v23 }
0x154a   :  { %v2904_v28 = vpop.xlane.xlu1 %2903 }
0x154b   :  { %v2905_v29 = vrot.slane %v2904_v28, 4 }
0x154d   :  { %v2906_v3 = vadd.f32 %v2905_v29, %v2904_v28 }
0x154f   :  { %v2907_v38 = vrot.slane %v2906_v3, 2 }
0x1551   :  { %v2908_v60 = vadd.f32 %v2907_v38, %v2906_v3 }
0x1553   :  { %v2909_v24 = vrot.slane %v2908_v60, 1 }
0x1555   :  { %v2910_v7 = vadd.f32 %v2909_v24, %v2908_v60 }
0x1557   :  { %3359 = vpush %v2910_v7 }
0x1588   :  { %s3360_s15 = spop %3359 }
0x1589   :  { %v2912_v34 = vstv %s3360_s15 }
0x158a   :  { %2914 = vst.msk [vmem:[#allocation9] sm:$0x1] %vm2913_vm10, %v2912_v34 }
0x158b   :  { %3537 = shalt.err (!%p3534_p0)
}
0x158c   :  { %s3538_s18 = scalar_lea.hbm %s4742_s7, 16 }
0x158d   :  { %p3539_p1 = scmp.ne.s32.totalorder %s4742_s7, %s3538_s18  ;;  %p3542_p2 = scmp.lt.u32.totalorder %s3538_s18, %s4742_s7 }
0x158f   :  { %p3544_p3 = pnand %p3542_p2, %p3539_p1 }
0x1591   :  { %3547 = shalt.err (!%p3544_p3)
}
0x1592   :  { %2924 = dma.vmem_to_hbm [thread:$0]  %s2922_s12, 16, %s4742_s7, [#allocation5]  }
0x1593   :  { %3552 = dma.done.wait [#allocation5], 16  }
0x1594   :  { %3553 = vsyncadd [#allocation5], 4294967280 }
0x1595   :  { %2928 = vsyncpa [#allocation4], 1 }
0x1596   :  { %2929 = vsyncpa [#allocation7], 1 }
0x1597   :  { %2930 = vsyncpa [#allocation5], 1 }

</bundles_post_ra>
